<compile_context>
chip_gen: v7x
topology: tpu7x:2x2x1
jax: 0.10.0
libtpu: 0.0.40
codegen_flags: <defaults>
</compile_context>

<pallas_src>
import functools

import jax
import jax.numpy as jnp
from jax.experimental import pallas as pl
from jax.experimental.pallas import tpu as pltpu


NEG_SLOPE = 0.2   # LeakyReLU slope used throughout the discriminator
BN_EPS = 1e-5


def _round_up(x, m):
    return ((x + m - 1) // m) * m


# ---------------------------------------------------------------------------
# Fused (im2col-matmul + bias + LeakyReLU) kernel — one per conv block.
# One grid step = one tile of TM output rows.
# ---------------------------------------------------------------------------
def _matmul_bias_lrelu_kernel(lhs_ref, w_ref, b_ref, o_ref, *, slope):
    # lhs_ref: (TM, K) bf16   w_ref: (K, Cout) bf16   b_ref: (1, Cout) f32
    acc = jnp.dot(lhs_ref[...], w_ref[...], preferred_element_type=jnp.float32)
    acc = acc + b_ref[...]
    o_ref[...] = jnp.where(acc >= 0, acc, slope * acc).astype(o_ref.dtype)


def fused_matmul_bias_lrelu(lhs_bf16, w_bf16, bias_f32, *, slope=NEG_SLOPE, tm=256):
    """LeakyReLU((M, K) @ (K, Cout) + bias); rows tiled over a parallel grid."""
    M, K = lhs_bf16.shape
    Kw, Cout = w_bf16.shape
    assert K == Kw
    tm = min(tm, _round_up(M, 8))
    Mp = _round_up(M, tm)
    if Mp != M:
        lhs_bf16 = jnp.pad(lhs_bf16, ((0, Mp - M), (0, 0)))
    bias_f32 = bias_f32.reshape(1, Cout).astype(jnp.float32)

    out = pl.pallas_call(
        functools.partial(_matmul_bias_lrelu_kernel, slope=slope),
        out_shape=jax.ShapeDtypeStruct((Mp, Cout), jnp.float32),
        grid=(Mp // tm,),
        in_specs=[
            pl.BlockSpec((tm, K), lambda i: (i, 0)),     # lane-dense im2col rows
            pl.BlockSpec((K, Cout), lambda i: (0, 0)),   # weights (resident)
            pl.BlockSpec((1, Cout), lambda i: (0, 0)),   # bias
        ],
        out_specs=pl.BlockSpec((tm, Cout), lambda i: (i, 0)),
        compiler_params=pltpu.CompilerParams(dimension_semantics=("parallel",)),
        cost_estimate=pl.CostEstimate(
            flops=2 * Mp * K * Cout,
            transcendentals=0,
            bytes_accessed=Mp * K * 2 + K * Cout * 2 + Cout * 4 + Mp * Cout * 4,
        ),
    )(lhs_bf16, w_bf16, bias_f32)
    return out[:M]


# ---------------------------------------------------------------------------
# XLA-side glue: im2col (patch extraction), handles stride 1 or 2.
# ---------------------------------------------------------------------------
def _im2col(x_nhwc, kernel_size, stride):
    """Extract (kh, kw, cin)-ordered patches -> ((N*Ho*Wo), KH*KW*Cin)."""
    N, H, W, C = x_nhwc.shape
    p = kernel_size // 2
    xp = jnp.pad(x_nhwc, ((0, 0), (p, p), (p, p), (0, 0)))
    Hp, Wp = H + 2 * p, W + 2 * p
    Ho = (Hp - kernel_size) // stride + 1
    Wo = (Wp - kernel_size) // stride + 1
    cols = []
    for kh in range(kernel_size):
        for kw in range(kernel_size):
            cols.append(xp[:, kh:kh + stride * (Ho - 1) + 1:stride,
                           kw:kw + stride * (Wo - 1) + 1:stride, :])
    patches = jnp.concatenate(cols, axis=-1)          # (N, Ho, Wo, K*K*C)
    return patches.reshape(N * Ho * Wo, kernel_size * kernel_size * C), Ho, Wo


def conv_block_forward(x_nhwc, blk, *, kernel_size, stride, batch_norm):
    """ConvolutionalBlock: Conv2d(k, stride, pad=k//2) [+BN] + LeakyReLU(0.2)."""
    w, b = blk["w"], blk["b"]
    if batch_norm:
        # TODO(synk): BatchNorm is applied with inference (running-stats)
        # semantics and folded into the conv; training-mode batch statistics
        # are not computed.
        scale = blk["gamma"] / jnp.sqrt(blk["var"] + BN_EPS)
        w = w * scale[:, None, None, None]
        b = (b - blk["mean"]) * scale + blk["beta"]
    Cout, Cin, KH, KW = w.shape
    # OIHW -> (KH*KW*Cin, Cout), tap-major, matching the im2col column order.
    w_mat = jnp.transpose(w, (2, 3, 1, 0)).reshape(KH * KW * Cin, Cout)
    lhs, Ho, Wo = _im2col(x_nhwc, kernel_size, stride)
    out = fused_matmul_bias_lrelu(lhs.astype(jnp.bfloat16),
                                  w_mat.astype(jnp.bfloat16), b)
    return out.reshape(x_nhwc.shape[0], Ho, Wo, Cout)


# ---------------------------------------------------------------------------
# Adaptive average pool (divisible case) + fused FC head kernel.
# ---------------------------------------------------------------------------
def adaptive_avg_pool_nhwc(x, out_hw=6):
    N, H, W, C = x.shape
    # TODO(synk): only the divisible case of AdaptiveAvgPool2d((6,6)) is
    # implemented (uniform bins); PyTorch's overlapping bins for H % 6 != 0
    # are not supported.
    assert H % out_hw == 0 and W % out_hw == 0
    fh, fw = H // out_hw, W // out_hw
    return x.reshape(N, out_hw, fh, out_hw, fw, C).mean(axis=(2, 4))


def _mlp_head_kernel(x_ref, w1_ref, b1_ref, w2_ref, b2_ref, o_ref, *, slope):
    h = jnp.dot(x_ref[...], w1_ref[...], preferred_element_type=jnp.float32)
    h = h + b1_ref[...]
    h = jnp.where(h >= 0, h, slope * h)
    # fc2 has a single output unit -> broadcast-mul + lane reduction (no (.,1) matmul).
    logit = jnp.sum(h * w2_ref[...], axis=-1, keepdims=True) + b2_ref[...]
    o_ref[...] = logit.astype(o_ref.dtype)


def mlp_head(feat, w1_hwc, b1, w2_row, b2, *, slope=NEG_SLOPE):
    N, _ = feat.shape
    fc = w1_hwc.shape[1]
    return pl.pallas_call(
        functools.partial(_mlp_head_kernel, slope=slope),
        out_shape=jax.ShapeDtypeStruct((N, 1), jnp.float32),
    )(feat.astype(jnp.float32),
      w1_hwc.astype(jnp.float32),
      b1.reshape(1, fc).astype(jnp.float32),
      w2_row.reshape(1, fc).astype(jnp.float32),
      b2.reshape(1, 1).astype(jnp.float32))


# ---------------------------------------------------------------------------
# Full Discriminator forward.
# ---------------------------------------------------------------------------
def discriminator_forward(imgs_nchw, params, *, kernel_size=3, n_blocks=4):
    # Single NCHW -> NHWC transpose; everything downstream is channels-last.
    x = jnp.transpose(imgs_nchw, (0, 2, 3, 1))
    for i in range(n_blocks):
        x = conv_block_forward(x, params["convs"][i],
                               kernel_size=kernel_size,
                               stride=1 if i % 2 == 0 else 2,
                               batch_norm=(i != 0))
    x = adaptive_avg_pool_nhwc(x, 6)
    N, Ho, Wo, C = x.shape
    feat = x.reshape(N, Ho * Wo * C)                  # (h, w, c) flatten order
    # fc1 weight is stored in PyTorch (fc_size, C*6*6) CHW-flatten convention;
    # permute its rows once to the HWC flatten order used above.
    w1 = params["fc1_w"]
    fc_size = w1.shape[0]
    w1_hwc = jnp.transpose(w1.reshape(fc_size, C, Ho, Wo), (2, 3, 1, 0))
    w1_hwc = w1_hwc.reshape(Ho * Wo * C, fc_size)
    logit = mlp_head(feat, w1_hwc, params["fc1_b"],
                     params["fc2_w"], params["fc2_b"])
    return logit[:, 0]


# ---------------------------------------------------------------------------
# Pure-JAX (lax.conv) reference — uses the same bf16 matmul inputs as the
# kernel so only accumulation order differs.
# ---------------------------------------------------------------------------
def _reference(imgs, params, *, kernel_size=3, n_blocks=4):
    x = imgs
    pad = kernel_size // 2
    for i in range(n_blocks):
        blk = params["convs"][i]
        w, b = blk["w"], blk["b"]
        if i != 0:
            scale = blk["gamma"] / jnp.sqrt(blk["var"] + BN_EPS)
            w = w * scale[:, None, None, None]
            b = (b - blk["mean"]) * scale + blk["beta"]
        stride = 1 if i % 2 == 0 else 2
        y = jax.lax.conv_general_dilated(
            x.astype(jnp.bfloat16), w.astype(jnp.bfloat16),
            window_strides=(stride, stride),
            padding=((pad, pad), (pad, pad)),
            dimension_numbers=("NCHW", "OIHW", "NCHW"),
            preferred_element_type=jnp.float32)
        y = y + b.reshape(1, -1, 1, 1)
        x = jnp.where(y >= 0, y, NEG_SLOPE * y)
    N, C, Hc, Wc = x.shape
    fh, fw = Hc // 6, Wc // 6
    pooled = x.reshape(N, C, 6, fh, 6, fw).mean(axis=(3, 5))
    feat = pooled.reshape(N, C * 36)                  # PyTorch CHW flatten
    h = feat @ params["fc1_w"].T + params["fc1_b"]
    h = jnp.where(h >= 0, h, NEG_SLOPE * h)
    logit = h @ params["fc2_w"].T + params["fc2_b"]
    return logit[:, 0]


# ---------------------------------------------------------------------------
# Deterministic parameter construction (matches the module's shapes).
# ---------------------------------------------------------------------------
def init_params(key, *, kernel_size=3, n_channels=64, n_blocks=8, fc_size=1024):
    keys = iter(jax.random.split(key, 8 * n_blocks + 8))
    convs = []
    in_c, out_c = 3, n_channels
    for i in range(n_blocks):
        out_c = (n_channels if i == 0 else in_c * 2) if i % 2 == 0 else in_c
        fan_in = in_c * kernel_size * kernel_size
        bound = 1.0 / (fan_in ** 0.5)
        blk = {
            "w": jax.random.uniform(next(keys),
                                    (out_c, in_c, kernel_size, kernel_size),
                                    minval=-bound, maxval=bound, dtype=jnp.float32),
            "b": jax.random.uniform(next(keys), (out_c,),
                                    minval=-bound, maxval=bound, dtype=jnp.float32),
        }
        if i != 0:  # BatchNorm2d params (inference-mode running stats)
            blk["gamma"] = 1.0 + 0.1 * jax.random.normal(next(keys), (out_c,), dtype=jnp.float32)
            blk["beta"] = 0.1 * jax.random.normal(next(keys), (out_c,), dtype=jnp.float32)
            blk["mean"] = 0.1 * jax.random.normal(next(keys), (out_c,), dtype=jnp.float32)
            blk["var"] = jax.random.uniform(next(keys), (out_c,),
                                            minval=0.5, maxval=1.5, dtype=jnp.float32)
        convs.append(blk)
        in_c = out_c
    feat = out_c * 6 * 6
    b1 = 1.0 / (feat ** 0.5)
    b2 = 1.0 / (fc_size ** 0.5)
    return {
        "convs": convs,
        "fc1_w": jax.random.uniform(next(keys), (fc_size, feat),
                                    minval=-b1, maxval=b1, dtype=jnp.float32),
        "fc1_b": jax.random.uniform(next(keys), (fc_size,),
                                    minval=-b1, maxval=b1, dtype=jnp.float32),
        "fc2_w": jax.random.uniform(next(keys), (1, fc_size),
                                    minval=-b2, maxval=b2, dtype=jnp.float32),
        "fc2_b": jax.random.uniform(next(keys), (1,),
                                    minval=-b2, maxval=b2, dtype=jnp.float32),
    }


if __name__ == "__main__":
    key = jax.random.PRNGKey(0)
    k_par, k_img = jax.random.split(key)

    # Small but structurally faithful Discriminator instantiation:
    # batch=2, 3-channel 48x48 images, n_blocks=4 (strides 1,2,1,2 -> 12x12
    # final feature map, exercising the 6x6 adaptive pooling), n_channels=8
    # (channels 8,8,16,16), fc_size=32.
    N, H, W = 2, 48, 48
    kernel_size, n_channels, n_blocks, fc_size = 3, 8, 4, 32

    params = init_params(k_par, kernel_size=kernel_size, n_channels=n_channels,
                         n_blocks=n_blocks, fc_size=fc_size)
    imgs = jax.random.normal(k_img, (N, 3, H, W), dtype=jnp.float32)

    fwd = jax.jit(functools.partial(discriminator_forward,
                                    kernel_size=kernel_size, n_blocks=n_blocks))
    logits = jax.block_until_ready(fwd(imgs, params))

    ref = _reference(imgs, params, kernel_size=kernel_size, n_blocks=n_blocks)
    assert logits.shape == (N,)
    assert jnp.allclose(logits, ref, rtol=1e-3, atol=1e-3), (logits, ref)

    print("KERNEL_OK")
</pallas_src>

<mosaic_0001>
module attributes {stable_mosaic.version = 11 : i64} {
  func.func @_matmul_bias_lrelu_kernel(%arg0: i32, %arg1: memref<256x27xbf16, #tpu.memory_space<vmem>>, %arg2: memref<27x8xbf16, #tpu.memory_space<vmem>>, %arg3: memref<1x8xf32, #tpu.memory_space<vmem>>, %arg4: memref<256x8xf32, #tpu.memory_space<vmem>>) attributes {dimension_semantics = [#tpu.dimension_semantics<parallel>], iteration_bounds = array<i64: 18>, scalar_prefetch = 0 : i64, scratch_operands = 0 : i64, tpu.core_type = #tpu.core_type<tc>, window_params = [{transform_indices = @transform_0, window_bounds = array<i64: 256, 27>}, {pipeline_mode = #tpu.pipeline_mode<synchronous>, transform_indices = @transform_1, window_bounds = array<i64: 27, 8>}, {pipeline_mode = #tpu.pipeline_mode<synchronous>, transform_indices = @transform_2, window_bounds = array<i64: 1, 8>}, {transform_indices = @transform_3, window_bounds = array<i64: 256, 8>}]} {
    %c0 = arith.constant 0 : index
    %c0_0 = arith.constant 0 : index
    %0 = vector.load %arg1[%c0, %c0_0] : memref<256x27xbf16, #tpu.memory_space<vmem>>, vector<256x27xbf16>
    %c0_1 = arith.constant 0 : index
    %c0_2 = arith.constant 0 : index
    %1 = vector.load %arg2[%c0_1, %c0_2] : memref<27x8xbf16, #tpu.memory_space<vmem>>, vector<27x8xbf16>
    %cst = arith.constant dense<0.000000e+00> : vector<256x8xf32>
    %2 = tpu.matmul %0, %1, %cst {dimension_numbers = #tpu.dot_dimension_numbers<[1], [0], [0], [1], [0, 0, 1, 1], [], []>} : vector<256x27xbf16>, vector<27x8xbf16>, vector<256x8xf32> -> vector<256x8xf32>
    %c0_3 = arith.constant 0 : index
    %c0_4 = arith.constant 0 : index
    %3 = vector.load %arg3[%c0_3, %c0_4] : memref<1x8xf32, #tpu.memory_space<vmem>>, vector<1x8xf32>
    %4 = vector.broadcast %3 : vector<1x8xf32> to vector<256x8xf32>
    %5 = arith.addf %2, %4 : vector<256x8xf32>
    %cst_5 = arith.constant 0.000000e+00 : f32
    %6 = vector.broadcast %cst_5 : f32 to vector<256x8xf32>
    %7 = arith.cmpf oge, %5, %6 : vector<256x8xf32>
    %cst_6 = arith.constant 2.000000e-01 : f32
    %8 = vector.broadcast %cst_6 : f32 to vector<256x8xf32>
    %9 = arith.mulf %8, %5 : vector<256x8xf32>
    %10 = arith.select %7, %5, %9 : vector<256x8xi1>, vector<256x8xf32>
    %c0_7 = arith.constant 0 : index
    %c0_8 = arith.constant 0 : index
    %11 = vector.load %arg4[%c0_7, %c0_8] : memref<256x8xf32, #tpu.memory_space<vmem>>, vector<256x8xf32>
    tpu.vector_store %arg4[%c0_7, %c0_8], %10 {strides = array<i32>} : memref<256x8xf32, #tpu.memory_space<vmem>>, vector<256x8xf32>,
    return
  }
  func.func @transform_0(%arg0: i32) -> (i32, i32) {
    %c0_i32 = arith.constant 0 : i32
    %c0_i32_0 = arith.constant 0 : i32
    return %arg0, %c0_i32 : i32, i32
  }
  func.func @transform_1(%arg0: i32) -> (i32, i32) {
    %c0_i32 = arith.constant 0 : i32
    %c0_i32_0 = arith.constant 0 : i32
    %c0_i32_1 = arith.constant 0 : i32
    return %c0_i32, %c0_i32_0 : i32, i32
  }
  func.func @transform_2(%arg0: i32) -> (i32, i32) {
    %c0_i32 = arith.constant 0 : i32
    %c0_i32_0 = arith.constant 0 : i32
    %c0_i32_1 = arith.constant 0 : i32
    return %c0_i32, %c0_i32_0 : i32, i32
  }
  func.func @transform_3(%arg0: i32) -> (i32, i32) {
    %c0_i32 = arith.constant 0 : i32
    %c0_i32_0 = arith.constant 0 : i32
    return %arg0, %c0_i32 : i32, i32
  }
}

module attributes {stable_mosaic.version = 11 : i64} {
  func.func @_matmul_bias_lrelu_kernel(%arg0: i32, %arg1: memref<256x72xbf16, #tpu.memory_space<vmem>>, %arg2: memref<72x8xbf16, #tpu.memory_space<vmem>>, %arg3: memref<1x8xf32, #tpu.memory_space<vmem>>, %arg4: memref<256x8xf32, #tpu.memory_space<vmem>>) attributes {dimension_semantics = [#tpu.dimension_semantics<parallel>], iteration_bounds = array<i64: 5>, scalar_prefetch = 0 : i64, scratch_operands = 0 : i64, tpu.core_type = #tpu.core_type<tc>, window_params = [{transform_indices = @transform_0, window_bounds = array<i64: 256, 72>}, {pipeline_mode = #tpu.pipeline_mode<synchronous>, transform_indices = @transform_1, window_bounds = array<i64: 72, 8>}, {pipeline_mode = #tpu.pipeline_mode<synchronous>, transform_indices = @transform_2, window_bounds = array<i64: 1, 8>}, {transform_indices = @transform_3, window_bounds = array<i64: 256, 8>}]} {
    %c0 = arith.constant 0 : index
    %c0_0 = arith.constant 0 : index
    %0 = vector.load %arg1[%c0, %c0_0] : memref<256x72xbf16, #tpu.memory_space<vmem>>, vector<256x72xbf16>
    %c0_1 = arith.constant 0 : index
    %c0_2 = arith.constant 0 : index
    %1 = vector.load %arg2[%c0_1, %c0_2] : memref<72x8xbf16, #tpu.memory_space<vmem>>, vector<72x8xbf16>
    %cst = arith.constant dense<0.000000e+00> : vector<256x8xf32>
    %2 = tpu.matmul %0, %1, %cst {dimension_numbers = #tpu.dot_dimension_numbers<[1], [0], [0], [1], [0, 0, 1, 1], [], []>} : vector<256x72xbf16>, vector<72x8xbf16>, vector<256x8xf32> -> vector<256x8xf32>
    %c0_3 = arith.constant 0 : index
    %c0_4 = arith.constant 0 : index
    %3 = vector.load %arg3[%c0_3, %c0_4] : memref<1x8xf32, #tpu.memory_space<vmem>>, vector<1x8xf32>
    %4 = vector.broadcast %3 : vector<1x8xf32> to vector<256x8xf32>
    %5 = arith.addf %2, %4 : vector<256x8xf32>
    %cst_5 = arith.constant 0.000000e+00 : f32
    %6 = vector.broadcast %cst_5 : f32 to vector<256x8xf32>
    %7 = arith.cmpf oge, %5, %6 : vector<256x8xf32>
    %cst_6 = arith.constant 2.000000e-01 : f32
    %8 = vector.broadcast %cst_6 : f32 to vector<256x8xf32>
    %9 = arith.mulf %8, %5 : vector<256x8xf32>
    %10 = arith.select %7, %5, %9 : vector<256x8xi1>, vector<256x8xf32>
    %c0_7 = arith.constant 0 : index
    %c0_8 = arith.constant 0 : index
    %11 = vector.load %arg4[%c0_7, %c0_8] : memref<256x8xf32, #tpu.memory_space<vmem>>, vector<256x8xf32>
    tpu.vector_store %arg4[%c0_7, %c0_8], %10 {strides = array<i32>} : memref<256x8xf32, #tpu.memory_space<vmem>>, vector<256x8xf32>,
    return
  }
  func.func @transform_0(%arg0: i32) -> (i32, i32) {
    %c0_i32 = arith.constant 0 : i32
    %c0_i32_0 = arith.constant 0 : i32
    return %arg0, %c0_i32 : i32, i32
  }
  func.func @transform_1(%arg0: i32) -> (i32, i32) {
    %c0_i32 = arith.constant 0 : i32
    %c0_i32_0 = arith.constant 0 : i32
    %c0_i32_1 = arith.constant 0 : i32
    return %c0_i32, %c0_i32_0 : i32, i32
  }
  func.func @transform_2(%arg0: i32) -> (i32, i32) {
    %c0_i32 = arith.constant 0 : i32
    %c0_i32_0 = arith.constant 0 : i32
    %c0_i32_1 = arith.constant 0 : i32
    return %c0_i32, %c0_i32_0 : i32, i32
  }
  func.func @transform_3(%arg0: i32) -> (i32, i32) {
    %c0_i32 = arith.constant 0 : i32
    %c0_i32_0 = arith.constant 0 : i32
    return %arg0, %c0_i32 : i32, i32
  }
}

module attributes {stable_mosaic.version = 11 : i64} {
  func.func @_matmul_bias_lrelu_kernel(%arg0: i32, %arg1: memref<256x72xbf16, #tpu.memory_space<vmem>>, %arg2: memref<72x16xbf16, #tpu.memory_space<vmem>>, %arg3: memref<1x16xf32, #tpu.memory_space<vmem>>, %arg4: memref<256x16xf32, #tpu.memory_space<vmem>>) attributes {dimension_semantics = [#tpu.dimension_semantics<parallel>], iteration_bounds = array<i64: 5>, scalar_prefetch = 0 : i64, scratch_operands = 0 : i64, tpu.core_type = #tpu.core_type<tc>, window_params = [{transform_indices = @transform_0, window_bounds = array<i64: 256, 72>}, {pipeline_mode = #tpu.pipeline_mode<synchronous>, transform_indices = @transform_1, window_bounds = array<i64: 72, 16>}, {pipeline_mode = #tpu.pipeline_mode<synchronous>, transform_indices = @transform_2, window_bounds = array<i64: 1, 16>}, {transform_indices = @transform_3, window_bounds = array<i64: 256, 16>}]} {
    %c0 = arith.constant 0 : index
    %c0_0 = arith.constant 0 : index
    %0 = vector.load %arg1[%c0, %c0_0] : memref<256x72xbf16, #tpu.memory_space<vmem>>, vector<256x72xbf16>
    %c0_1 = arith.constant 0 : index
    %c0_2 = arith.constant 0 : index
    %1 = vector.load %arg2[%c0_1, %c0_2] : memref<72x16xbf16, #tpu.memory_space<vmem>>, vector<72x16xbf16>
    %cst = arith.constant dense<0.000000e+00> : vector<256x16xf32>
    %2 = tpu.matmul %0, %1, %cst {dimension_numbers = #tpu.dot_dimension_numbers<[1], [0], [0], [1], [0, 0, 1, 1], [], []>} : vector<256x72xbf16>, vector<72x16xbf16>, vector<256x16xf32> -> vector<256x16xf32>
    %c0_3 = arith.constant 0 : index
    %c0_4 = arith.constant 0 : index
    %3 = vector.load %arg3[%c0_3, %c0_4] : memref<1x16xf32, #tpu.memory_space<vmem>>, vector<1x16xf32>
    %4 = vector.broadcast %3 : vector<1x16xf32> to vector<256x16xf32>
    %5 = arith.addf %2, %4 : vector<256x16xf32>
    %cst_5 = arith.constant 0.000000e+00 : f32
    %6 = vector.broadcast %cst_5 : f32 to vector<256x16xf32>
    %7 = arith.cmpf oge, %5, %6 : vector<256x16xf32>
    %cst_6 = arith.constant 2.000000e-01 : f32
    %8 = vector.broadcast %cst_6 : f32 to vector<256x16xf32>
    %9 = arith.mulf %8, %5 : vector<256x16xf32>
    %10 = arith.select %7, %5, %9 : vector<256x16xi1>, vector<256x16xf32>
    %c0_7 = arith.constant 0 : index
    %c0_8 = arith.constant 0 : index
    %11 = vector.load %arg4[%c0_7, %c0_8] : memref<256x16xf32, #tpu.memory_space<vmem>>, vector<256x16xf32>
    tpu.vector_store %arg4[%c0_7, %c0_8], %10 {strides = array<i32>} : memref<256x16xf32, #tpu.memory_space<vmem>>, vector<256x16xf32>,
    return
  }
  func.func @transform_0(%arg0: i32) -> (i32, i32) {
    %c0_i32 = arith.constant 0 : i32
    %c0_i32_0 = arith.constant 0 : i32
    return %arg0, %c0_i32 : i32, i32
  }
  func.func @transform_1(%arg0: i32) -> (i32, i32) {
    %c0_i32 = arith.constant 0 : i32
    %c0_i32_0 = arith.constant 0 : i32
    %c0_i32_1 = arith.constant 0 : i32
    return %c0_i32, %c0_i32_0 : i32, i32
  }
  func.func @transform_2(%arg0: i32) -> (i32, i32) {
    %c0_i32 = arith.constant 0 : i32
    %c0_i32_0 = arith.constant 0 : i32
    %c0_i32_1 = arith.constant 0 : i32
    return %c0_i32, %c0_i32_0 : i32, i32
  }
  func.func @transform_3(%arg0: i32) -> (i32, i32) {
    %c0_i32 = arith.constant 0 : i32
    %c0_i32_0 = arith.constant 0 : i32
    return %arg0, %c0_i32 : i32, i32
  }
}

module attributes {stable_mosaic.version = 11 : i64} {
  func.func @_matmul_bias_lrelu_kernel(%arg0: i32, %arg1: memref<256x144xbf16, #tpu.memory_space<vmem>>, %arg2: memref<144x16xbf16, #tpu.memory_space<vmem>>, %arg3: memref<1x16xf32, #tpu.memory_space<vmem>>, %arg4: memref<256x16xf32, #tpu.memory_space<vmem>>) attributes {dimension_semantics = [#tpu.dimension_semantics<parallel>], iteration_bounds = array<i64: 2>, scalar_prefetch = 0 : i64, scratch_operands = 0 : i64, tpu.core_type = #tpu.core_type<tc>, window_params = [{transform_indices = @transform_0, window_bounds = array<i64: 256, 144>}, {pipeline_mode = #tpu.pipeline_mode<synchronous>, transform_indices = @transform_1, window_bounds = array<i64: 144, 16>}, {pipeline_mode = #tpu.pipeline_mode<synchronous>, transform_indices = @transform_2, window_bounds = array<i64: 1, 16>}, {transform_indices = @transform_3, window_bounds = array<i64: 256, 16>}]} {
    %c0 = arith.constant 0 : index
    %c0_0 = arith.constant 0 : index
    %0 = vector.load %arg1[%c0, %c0_0] : memref<256x144xbf16, #tpu.memory_space<vmem>>, vector<256x144xbf16>
    %c0_1 = arith.constant 0 : index
    %c0_2 = arith.constant 0 : index
    %1 = vector.load %arg2[%c0_1, %c0_2] : memref<144x16xbf16, #tpu.memory_space<vmem>>, vector<144x16xbf16>
    %cst = arith.constant dense<0.000000e+00> : vector<256x16xf32>
    %2 = tpu.matmul %0, %1, %cst {dimension_numbers = #tpu.dot_dimension_numbers<[1], [0], [0], [1], [0, 0, 1, 1], [], []>} : vector<256x144xbf16>, vector<144x16xbf16>, vector<256x16xf32> -> vector<256x16xf32>
    %c0_3 = arith.constant 0 : index
    %c0_4 = arith.constant 0 : index
    %3 = vector.load %arg3[%c0_3, %c0_4] : memref<1x16xf32, #tpu.memory_space<vmem>>, vector<1x16xf32>
    %4 = vector.broadcast %3 : vector<1x16xf32> to vector<256x16xf32>
    %5 = arith.addf %2, %4 : vector<256x16xf32>
    %cst_5 = arith.constant 0.000000e+00 : f32
    %6 = vector.broadcast %cst_5 : f32 to vector<256x16xf32>
    %7 = arith.cmpf oge, %5, %6 : vector<256x16xf32>
    %cst_6 = arith.constant 2.000000e-01 : f32
    %8 = vector.broadcast %cst_6 : f32 to vector<256x16xf32>
    %9 = arith.mulf %8, %5 : vector<256x16xf32>
    %10 = arith.select %7, %5, %9 : vector<256x16xi1>, vector<256x16xf32>
    %c0_7 = arith.constant 0 : index
    %c0_8 = arith.constant 0 : index
    %11 = vector.load %arg4[%c0_7, %c0_8] : memref<256x16xf32, #tpu.memory_space<vmem>>, vector<256x16xf32>
    tpu.vector_store %arg4[%c0_7, %c0_8], %10 {strides = array<i32>} : memref<256x16xf32, #tpu.memory_space<vmem>>, vector<256x16xf32>,
    return
  }
  func.func @transform_0(%arg0: i32) -> (i32, i32) {
    %c0_i32 = arith.constant 0 : i32
    %c0_i32_0 = arith.constant 0 : i32
    return %arg0, %c0_i32 : i32, i32
  }
  func.func @transform_1(%arg0: i32) -> (i32, i32) {
    %c0_i32 = arith.constant 0 : i32
    %c0_i32_0 = arith.constant 0 : i32
    %c0_i32_1 = arith.constant 0 : i32
    return %c0_i32, %c0_i32_0 : i32, i32
  }
  func.func @transform_2(%arg0: i32) -> (i32, i32) {
    %c0_i32 = arith.constant 0 : i32
    %c0_i32_0 = arith.constant 0 : i32
    %c0_i32_1 = arith.constant 0 : i32
    return %c0_i32, %c0_i32_0 : i32, i32
  }
  func.func @transform_3(%arg0: i32) -> (i32, i32) {
    %c0_i32 = arith.constant 0 : i32
    %c0_i32_0 = arith.constant 0 : i32
    return %arg0, %c0_i32 : i32, i32
  }
}

module attributes {stable_mosaic.version = 11 : i64} {
  func.func @_mlp_head_kernel(%arg0: memref<2x576xf32, #tpu.memory_space<vmem>>, %arg1: memref<576x32xf32, #tpu.memory_space<vmem>>, %arg2: memref<1x32xf32, #tpu.memory_space<vmem>>, %arg3: memref<1x32xf32, #tpu.memory_space<vmem>>, %arg4: memref<1x1xf32, #tpu.memory_space<vmem>>, %arg5: memref<2x1xf32, #tpu.memory_space<vmem>>) attributes {dimension_semantics = [], scalar_prefetch = 0 : i64, scratch_operands = 0 : i64, tpu.core_type = #tpu.core_type<tc>} {
    %c0 = arith.constant 0 : index
    %c0_0 = arith.constant 0 : index
    %0 = vector.load %arg0[%c0, %c0_0] : memref<2x576xf32, #tpu.memory_space<vmem>>, vector<2x576xf32>
    %c0_1 = arith.constant 0 : index
    %c0_2 = arith.constant 0 : index
    %1 = vector.load %arg1[%c0_1, %c0_2] : memref<576x32xf32, #tpu.memory_space<vmem>>, vector<576x32xf32>
    %cst = arith.constant dense<0.000000e+00> : vector<2x32xf32>
    %2 = tpu.matmul %0, %1, %cst {dimension_numbers = #tpu.dot_dimension_numbers<[1], [0], [0], [1], [0, 0, 1, 1], [], []>} : vector<2x576xf32>, vector<576x32xf32>, vector<2x32xf32> -> vector<2x32xf32>
    %c0_3 = arith.constant 0 : index
    %c0_4 = arith.constant 0 : index
    %3 = vector.load %arg2[%c0_3, %c0_4] : memref<1x32xf32, #tpu.memory_space<vmem>>, vector<1x32xf32>
    %4 = vector.broadcast %3 : vector<1x32xf32> to vector<2x32xf32>
    %5 = arith.addf %2, %4 : vector<2x32xf32>
    %cst_5 = arith.constant 0.000000e+00 : f32
    %6 = vector.broadcast %cst_5 : f32 to vector<2x32xf32>
    %7 = arith.cmpf oge, %5, %6 : vector<2x32xf32>
    %cst_6 = arith.constant 2.000000e-01 : f32
    %8 = vector.broadcast %cst_6 : f32 to vector<2x32xf32>
    %9 = arith.mulf %8, %5 : vector<2x32xf32>
    %10 = arith.select %7, %5, %9 : vector<2x32xi1>, vector<2x32xf32>
    %c0_7 = arith.constant 0 : index
    %c0_8 = arith.constant 0 : index
    %11 = vector.load %arg3[%c0_7, %c0_8] : memref<1x32xf32, #tpu.memory_space<vmem>>, vector<1x32xf32>
    %12 = vector.broadcast %11 : vector<1x32xf32> to vector<2x32xf32>
    %13 = arith.mulf %10, %12 : vector<2x32xf32>
    %cst_9 = arith.constant dense<0.000000e+00> : vector<2xf32>
    %14 = vector.multi_reduction <add>, %13, %cst_9 [1] : vector<2x32xf32> to vector<2xf32>
    %15 = vector.shape_cast %14 : vector<2xf32> to vector<2x1xf32>
    %c0_10 = arith.constant 0 : index
    %c0_11 = arith.constant 0 : index
    %16 = vector.load %arg4[%c0_10, %c0_11] : memref<1x1xf32, #tpu.memory_space<vmem>>, vector<1x1xf32>
    %17 = vector.broadcast %16 : vector<1x1xf32> to vector<2x1xf32>
    %18 = arith.addf %15, %17 : vector<2x1xf32>
    %c0_12 = arith.constant 0 : index
    %c0_13 = arith.constant 0 : index
    %19 = vector.load %arg5[%c0_12, %c0_13] : memref<2x1xf32, #tpu.memory_space<vmem>>, vector<2x1xf32>
    tpu.vector_store %arg5[%c0_12, %c0_13], %18 {strides = array<i32>} : memref<2x1xf32, #tpu.memory_space<vmem>>, vector<2x1xf32>,
    return
  }
}

</mosaic_0001>

<bundles_post_ra>
// kernel: discriminator_forward.5
= control target key start
LH: loop header
LB: loop body
LE: loop exit
PB: predicated region body
PF: predicated region fallthrough
CT: control target
= control target key end

     0   :  { %s871_s12 = smov 0   ;;  %s1035_s0 = inlined_call_operand.vmem [shape: bf16[4608,27], index: 0, kind: input, shape index: {}]   ;;  %s1036_s1 = inlined_call_operand.vmem [shape: bf16[27,8], index: 1, kind: input, shape index: {}]   ;;  %s1037_s2 = inlined_call_operand.vmem [shape: f32[1,8], index: 2, kind: input, shape index: {}]   ;;  %s1038_s3 = inlined_call_operand.vmem [shape: f32[4608,8], index: 3, kind: output, shape index: {}]  }
   0x1 LB: > { %s711_s13 = sadd.s32 4294967295, %s848_s12   ;;  %p715_p0 = scmp.ge.s32.totalorder %s848_s12, 1  ;;  %s848_s12 = sphi %s871_s12, %s13_s12  }
   0x2   : > { %p138_p1 = scmp.lt.s32.totalorder %s848_s12, 19 }
   0x4   : > { %p139_p2 = pnand %p715_p0, %p138_p1 }
   0x5   : > { %v824_v0 = vld [vmem:[%s1036_s1] sm:$0xff] (!%p139_p2)   ;;  %vm358_vm0 = vcmask (!%p139_p2), 1044480   ;;  %v825_v1 = vld [vmem:[%s1036_s1 + $0x8] sm:$0x3f] (!%p139_p2)   ;;  %vm359_vm1 = vcmask (!%p139_p2), 1045504   ;;  %s716_s18 = sshll.u32 (!%p139_p2), %s711_s13, 5 }
   0x6   : > { %142 = sbr.rel (%p139_p2) target bundleno = 267 (0x10b), region = 32  ;;  %775 = vmatprep.subr.bf16.mxu0 (!%p139_p2), %v824_v0  ;;  %811 = vmatprep.subr.bf16.mxu1 (!%p139_p2), %v824_v0  ;;  %v850_v2 = vmov (!%p139_p2), 65535   ;;  %p163_p3 = scmp.lt.s32.totalorder (!%p139_p2), %s716_s18, 575  ;;  %vm309_vm2 = vcmask (!%p139_p2), 220160   ;;  %v928_v22 = vld [vmem:[%s1037_s2] ss:$0 sm:$0xff] (!%p139_p2) }
   0x7   : > { %776 = vmatpush3.bf16.msra.mxu0 (!%p139_p2), %v824_v0  ;;  %813 = vmatpush3.bf16.msra.mxu1 (!%p139_p2), %v824_v0  ;;  %v360_v3 = vsel (!%p139_p2), %vm358_vm0, 4294967295, %v850_v2  ;;  %vm622_vm3 = vcmask (!%p139_p2), 64512  }
   0x8   : > { %v361_v4 = vsel (!%p139_p2), %vm359_vm1, %v360_v3, 0 }
   0x9   : > { %v363_v5 = vand.u32 (!%p139_p2), %v825_v1, %v361_v4 }
   0xb   : > { %777 = vmatprep.subr.bf16.mxu0 (!%p139_p2), %v363_v5  ;;  %812 = vmatprep.subr.bf16.mxu1 (!%p139_p2), %v363_v5 }
   0xc   : > { %778 = vmatpush3.bf16.msra.mxu0 (!%p139_p2), %v363_v5  ;;  %814 = vmatpush3.bf16.msra.mxu1 (!%p139_p2), %v363_v5 }
   0xd   : > { %s1040_s18 = smov (!%p163_p3, %s716_s18), 575 }
   0xe   : > { %s717_s19 = sshll.u32 %s1040_s18, 2  ;;  %s719_s25 = sshll.u32 %s1040_s18, 3 }
   0xf   : > { %s891_s22 = scalar_lea.vmem %s1035_s0, %s717_s19  ;;  %s937_s28 = scalar_lea.vmem %s1038_s3, %s719_s25 }
  0x10   : > { %v826_v6 = vld [vmem:[%s891_s22] sm:$0xff]   ;;  %v828_v8 = vld [vmem:[%s891_s22 + $0x8] sm:$0xff]   ;;  %v830_v10 = vld [vmem:[%s891_s22 + $0x10] sm:$0xff]  }
  0x11   : > { %v827_v7 = vld [vmem:[%s891_s22 + $0x40] sm:$0xff]   ;;  %779 = vmatprep.mubr.msk.bf16.mxu0 %vm309_vm2, %v826_v6  ;;  %v829_v9 = vld [vmem:[%s891_s22 + $0x48] sm:$0xff]   ;;  %v831_v11 = vld [vmem:[%s891_s22 + $0x50] sm:$0xff]  }
  0x12   : > { %795 = vmatprep.mubr.msk.bf16.mxu1 %vm309_vm2, %v827_v7  ;;  %780 = vmatmul.mubr.msk.bf16.vlgmr.msra.gmra.mrb[0].mxu0 %vm309_vm2, %v828_v8  ;;  %v832_v12 = vld [vmem:[%s891_s22 + $0x18] sm:$0xff]   ;;  %v834_v14 = vld [vmem:[%s891_s22 + $0x20] sm:$0xff]   ;;  %v836_v16 = vld [vmem:[%s891_s22 + $0x28] sm:$0xff]  }
  0x13   : > { %796 = vmatmul.mubr.msk.bf16.vlgmr.msra.gmra.mrb[0].mxu1 %vm309_vm2, %v829_v9  ;;  %783 = vmatprep.mubr.msk.bf16.mxu0 %vm309_vm2, %v830_v10  ;;  %v833_v13 = vld [vmem:[%s891_s22 + $0x58] sm:$0xff]   ;;  %v835_v15 = vld [vmem:[%s891_s22 + $0x60] sm:$0xff]   ;;  %v837_v17 = vld [vmem:[%s891_s22 + $0x68] sm:$0xff]  }
  0x14   : > { %799 = vmatprep.mubr.msk.bf16.mxu1 %vm309_vm2, %v831_v11  ;;  %v838_v18 = vld [vmem:[%s891_s22 + $0x30] sm:$0xff]   ;;  %v840_v20 = vld [vmem:[%s891_s22 + $0x38] sm:$0xff]  }
  0x15   : > { %v839_v19 = vld [vmem:[%s891_s22 + $0x70] sm:$0xff]   ;;  %v841_v21 = vld [vmem:[%s891_s22 + $0x78] sm:$0xff]  }
  0x1a   : > { %784 = vmatmul.mubr.msk.bf16.gmra.mrb[4].mxu0 %vm309_vm2, %v832_v12 }
  0x1b   : > { %800 = vmatmul.mubr.msk.bf16.gmra.mrb[4].mxu1 %vm309_vm2, %v833_v13  ;;  %787 = vmatprep.mubr.msk.bf16.mxu0 %vm309_vm2, %v834_v14 }
  0x1c   : > { %803 = vmatprep.mubr.msk.bf16.mxu1 %vm309_vm2, %v835_v15 }
  0x22   : > { %788 = vmatmul.mubr.msk.bf16.gmra.mrb[8].mxu0 %vm309_vm2, %v836_v16 }
  0x23   : > { %804 = vmatmul.mubr.msk.bf16.gmra.mrb[8].mxu1 %vm309_vm2, %v837_v17  ;;  %791 = vmatprep.mubr.msk.bf16.mxu0 %vm309_vm2, %v838_v18 }
  0x24   : > { %807 = vmatprep.mubr.msk.bf16.mxu1 %vm309_vm2, %v839_v19 }
  0x2a   : > { %792 = vmatmul.mubr.msk.bf16.gmra.mrb[12].mxu0 %vm309_vm2, %v840_v20 }
  0x2b   : > { %808 = vmatmul.mubr.msk.bf16.gmra.mrb[12].mxu1 %vm309_vm2, %v841_v21 }
  0xe5   : > { %v781_v23 = vpop.f32.mrb[0].mxu0 }
  0xe6   : > { %v408_v24 = vadd.f32 %v781_v23, %v928_v22  ;;  %v797_v25 = vpop.f32.mrb[0].mxu1  ;;  %v399_v26 = vpop.f32.mrb[1].mxu0 }
  0xe7   : > { %v472_v27 = vadd.f32 %v797_v25, %v928_v22  ;;  %v400_v28 = vadd.f32 %v928_v22, %v399_v26  ;;  %v463_v29 = vpop.f32.mrb[1].mxu1  ;;  %v782_v30 = vpop.f32.mrb[2].mxu0 }
  0xe8   : > { %vm528_vm4 = vcmp.ge.f32.partialorder %v408_v24, 0.0  ;;  %v560_v31 = vmul.f32 0.2, %v408_v24  ;;  %v464_v32 = vadd.f32 %v928_v22, %v463_v29  ;;  %v411_v33 = vadd.f32 %v782_v30, %v928_v22  ;;  %v798_v34 = vpop.f32.mrb[2].mxu1  ;;  %v402_v35 = vpop.f32.mrb[3].mxu0 }
  0xe9   : > { %vm544_vm5 = vcmp.ge.f32.partialorder %v472_v27, 0.0  ;;  %v576_v36 = vmul.f32 0.2, %v472_v27  ;;  %vm526_vm6 = vcmp.ge.f32.partialorder %v400_v28, 0.0  ;;  %v558_v37 = vmul.f32 0.2, %v400_v28 }
  0xea   : > { %v592_v38 = vsel %vm528_vm4, %v408_v24, %v560_v31  ;;  %vm542_vm7 = vcmp.ge.f32.partialorder %v464_v32, 0.0  ;;  %v574_v39 = vmul.f32 0.2, %v464_v32  ;;  %vm529_vm8 = vcmp.ge.f32.partialorder %v411_v33, 0.0  ;;  %v466_v40 = vpop.f32.mrb[3].mxu1 }
  0xeb   : > { %625 = vst.msk [vmem:[%s937_s28 + $0x10] sm:$0xff] %vm622_vm3, %v592_v38  ;;  %v608_v41 = vsel %vm544_vm5, %v472_v27, %v576_v36  ;;  %v590_v42 = vsel %vm526_vm6, %v400_v28, %v558_v37  ;;  %v561_v43 = vmul.f32 0.2, %v411_v33  ;;  %v475_v44 = vadd.f32 %v798_v34, %v928_v22 }
  0xec   : > { %641 = vst.msk [vmem:[%s937_s28 + $0x90] sm:$0xff] %vm622_vm3, %v608_v41  ;;  %623 = vst.msk [vmem:[%s937_s28] sm:$0xff] %vm622_vm3, %v590_v42  ;;  %v606_v45 = vsel %vm542_vm7, %v464_v32, %v574_v39  ;;  %v403_v46 = vadd.f32 %v928_v22, %v402_v35  ;;  %v467_v47 = vadd.f32 %v928_v22, %v466_v40 }
  0xed   : > { %639 = vst.msk [vmem:[%s937_s28 + $0x80] sm:$0xff] %vm622_vm3, %v606_v45  ;;  %v593_v48 = vsel %vm529_vm8, %v411_v33, %v561_v43  ;;  %vm545_vm9 = vcmp.ge.f32.partialorder %v475_v44, 0.0  ;;  %v577_v49 = vmul.f32 0.2, %v475_v44  ;;  %v785_v50 = vpop.f32.mrb[4].mxu0 }
  0xee   : > { %626 = vst.msk [vmem:[%s937_s28 + $0x18] sm:$0xff] %vm622_vm3, %v593_v48  ;;  %vm527_vm10 = vcmp.ge.f32.partialorder %v403_v46, 0.0  ;;  %v559_v51 = vmul.f32 0.2, %v403_v46  ;;  %vm543_vm11 = vcmp.ge.f32.partialorder %v467_v47, 0.0  ;;  %v424_v54 = vadd.f32 %v785_v50, %v928_v22  ;;  %v801_v55 = vpop.f32.mrb[4].mxu1 }
  0xef   : > { %v575_v52 = vmul.f32 0.2, %v467_v47  ;;  %v609_v53 = vsel %vm545_vm9, %v475_v44, %v577_v49  ;;  %v415_v56 = vpop.f32.mrb[5].mxu0  ;;  %v488_v59 = vadd.f32 %v801_v55, %v928_v22  ;;  %v479_v61 = vpop.f32.mrb[5].mxu1 }
  0xf0   : > { %642 = vst.msk [vmem:[%s937_s28 + $0x98] sm:$0xff] %vm622_vm3, %v609_v53  ;;  %v591_v57 = vsel %vm527_vm10, %v403_v46, %v559_v51  ;;  %v416_v60 = vadd.f32 %v928_v22, %v415_v56  ;;  %v786_v62 = vpop.f32.mrb[6].mxu0  ;;  %vm532_vm12 = vcmp.ge.f32.partialorder %v424_v54, 0.0  ;;  %v564_v63 = vmul.f32 0.2, %v424_v54  ;;  %v802_v2 = vpop.f32.mrb[6].mxu1 }
  0xf1   : > { %v607_v58 = vsel %vm543_vm11, %v467_v47, %v575_v52  ;;  %624 = vst.msk [vmem:[%s937_s28 + $0x8] sm:$0xff] %vm622_vm3, %v591_v57  ;;  %v480_v0 = vadd.f32 %v928_v22, %v479_v61  ;;  %v427_v1 = vadd.f32 %v786_v62, %v928_v22  ;;  %v418_v3 = vpop.f32.mrb[7].mxu0  ;;  %vm548_vm13 = vcmp.ge.f32.partialorder %v488_v59, 0.0  ;;  %v482_v8 = vpop.f32.mrb[7].mxu1 }
  0xf2   : > { %640 = vst.msk [vmem:[%s937_s28 + $0x88] sm:$0xff] %vm622_vm3, %v607_v58  ;;  %v580_v4 = vmul.f32 0.2, %v488_v59  ;;  %vm530_vm14 = vcmp.ge.f32.partialorder %v416_v60, 0.0  ;;  %v562_v5 = vmul.f32 0.2, %v416_v60  ;;  %v596_v6 = vsel %vm532_vm12, %v424_v54, %v564_v63 }
  0xf3   : > { %vm546_vm15 = vcmp.ge.f32.partialorder %v480_v0, 0.0  ;;  %v578_v7 = vmul.f32 0.2, %v480_v0  ;;  %vm533_vm0 = vcmp.ge.f32.partialorder %v427_v1, 0.0  ;;  %629 = vst.msk [vmem:[%s937_s28 + $0x30] sm:$0xff] %vm622_vm3, %v596_v6  ;;  %v491_v12 = vadd.f32 %v802_v2, %v928_v22 }
  0xf4   : > { %v612_v9 = vsel %vm548_vm13, %v488_v59, %v580_v4  ;;  %v594_v10 = vsel %vm530_vm14, %v416_v60, %v562_v5  ;;  %v565_v11 = vmul.f32 0.2, %v427_v1  ;;  %v419_v14 = vadd.f32 %v928_v22, %v418_v3 }
  0xf5   : > { %645 = vst.msk [vmem:[%s937_s28 + $0xb0] sm:$0xff] %vm622_vm3, %v612_v9  ;;  %627 = vst.msk [vmem:[%s937_s28 + $0x20] sm:$0xff] %vm622_vm3, %v594_v10  ;;  %v610_v13 = vsel %vm546_vm15, %v480_v0, %v578_v7  ;;  %v483_v15 = vadd.f32 %v928_v22, %v482_v8  ;;  %v789_v16 = vpop.f32.mrb[8].mxu0  ;;  %vm549_vm1 = vcmp.ge.f32.partialorder %v491_v12, 0.0  ;;  %v581_v18 = vmul.f32 0.2, %v491_v12 }
  0xf6   : > { %643 = vst.msk [vmem:[%s937_s28 + $0xa0] sm:$0xff] %vm622_vm3, %v610_v13  ;;  %v597_v17 = vsel %vm533_vm0, %v427_v1, %v565_v11  ;;  %v440_v19 = vadd.f32 %v789_v16, %v928_v22  ;;  %v805_v20 = vpop.f32.mrb[8].mxu1  ;;  %v431_v21 = vpop.f32.mrb[9].mxu0  ;;  %vm531_vm2 = vcmp.ge.f32.partialorder %v419_v14, 0.0  ;;  %v563_v23 = vmul.f32 0.2, %v419_v14 }
  0xf7   : > { %630 = vst.msk [vmem:[%s937_s28 + $0x38] sm:$0xff] %vm622_vm3, %v597_v17  ;;  %vm547_vm4 = vcmp.ge.f32.partialorder %v483_v15, 0.0  ;;  %v579_v24 = vmul.f32 0.2, %v483_v15  ;;  %v613_v25 = vsel %vm549_vm1, %v491_v12, %v581_v18  ;;  %v504_v27 = vadd.f32 %v805_v20, %v928_v22  ;;  %v495_v28 = vpop.f32.mrb[9].mxu1  ;;  %v790_v29 = vpop.f32.mrb[10].mxu0 }
  0xf8   : > { %vm536_vm5 = vcmp.ge.f32.partialorder %v440_v19, 0.0  ;;  %v568_v26 = vmul.f32 0.2, %v440_v19  ;;  %646 = vst.msk [vmem:[%s937_s28 + $0xb8] sm:$0xff] %vm622_vm3, %v613_v25  ;;  %v595_v30 = vsel %vm531_vm2, %v419_v14, %v563_v23  ;;  %v432_v32 = vadd.f32 %v928_v22, %v431_v21  ;;  %v806_v34 = vpop.f32.mrb[10].mxu1  ;;  %v434_v35 = vpop.f32.mrb[11].mxu0 }
  0xf9   : > { %v611_v31 = vsel %vm547_vm4, %v483_v15, %v579_v24  ;;  %v496_v33 = vadd.f32 %v928_v22, %v495_v28  ;;  %628 = vst.msk [vmem:[%s937_s28 + $0x28] sm:$0xff] %vm622_vm3, %v595_v30  ;;  %vm552_vm6 = vcmp.ge.f32.partialorder %v504_v27, 0.0  ;;  %v584_v37 = vmul.f32 0.2, %v504_v27  ;;  %v498_v39 = vpop.f32.mrb[11].mxu1 }
  0xfa   : > { %644 = vst.msk [vmem:[%s937_s28 + $0xa8] sm:$0xff] %vm622_vm3, %v611_v31  ;;  %v600_v36 = vsel %vm536_vm5, %v440_v19, %v568_v26  ;;  %v443_v38 = vadd.f32 %v790_v29, %v928_v22  ;;  %vm534_vm7 = vcmp.ge.f32.partialorder %v432_v32, 0.0  ;;  %v566_v40 = vmul.f32 0.2, %v432_v32 }
  0xfb   : > { %633 = vst.msk [vmem:[%s937_s28 + $0x50] sm:$0xff] %vm622_vm3, %v600_v36  ;;  %vm550_vm8 = vcmp.ge.f32.partialorder %v496_v33, 0.0  ;;  %v582_v41 = vmul.f32 0.2, %v496_v33  ;;  %v616_v42 = vsel %vm552_vm6, %v504_v27, %v584_v37  ;;  %v507_v44 = vadd.f32 %v806_v34, %v928_v22 }
  0xfc   : > { %vm537_vm9 = vcmp.ge.f32.partialorder %v443_v38, 0.0  ;;  %v569_v43 = vmul.f32 0.2, %v443_v38  ;;  %649 = vst.msk [vmem:[%s937_s28 + $0xd0] sm:$0xff] %vm622_vm3, %v616_v42  ;;  %v598_v45 = vsel %vm534_vm7, %v432_v32, %v566_v40  ;;  %v435_v47 = vadd.f32 %v928_v22, %v434_v35 }
  0xfd   : > { %v614_v46 = vsel %vm550_vm8, %v496_v33, %v582_v41  ;;  %v499_v48 = vadd.f32 %v928_v22, %v498_v39  ;;  %v793_v49 = vpop.f32.mrb[12].mxu0  ;;  %631 = vst.msk [vmem:[%s937_s28 + $0x40] sm:$0xff] %vm622_vm3, %v598_v45  ;;  %vm553_vm10 = vcmp.ge.f32.partialorder %v507_v44, 0.0  ;;  %v585_v51 = vmul.f32 0.2, %v507_v44 }
  0xfe   : > { %647 = vst.msk [vmem:[%s937_s28 + $0xc0] sm:$0xff] %vm622_vm3, %v614_v46  ;;  %v601_v50 = vsel %vm537_vm9, %v443_v38, %v569_v43  ;;  %v456_v52 = vadd.f32 %v793_v49, %v928_v22  ;;  %v809_v53 = vpop.f32.mrb[12].mxu1  ;;  %v447_v54 = vpop.f32.mrb[13].mxu0  ;;  %vm535_vm11 = vcmp.ge.f32.partialorder %v435_v47, 0.0  ;;  %v567_v55 = vmul.f32 0.2, %v435_v47 }
  0xff   : > { %634 = vst.msk [vmem:[%s937_s28 + $0x58] sm:$0xff] %vm622_vm3, %v601_v50  ;;  %vm551_vm12 = vcmp.ge.f32.partialorder %v499_v48, 0.0  ;;  %v583_v56 = vmul.f32 0.2, %v499_v48  ;;  %v617_v57 = vsel %vm553_vm10, %v507_v44, %v585_v51  ;;  %v520_v59 = vadd.f32 %v809_v53, %v928_v22  ;;  %v511_v60 = vpop.f32.mrb[13].mxu1  ;;  %v794_v61 = vpop.f32.mrb[14].mxu0 }
 0x100   : > { %vm540_vm13 = vcmp.ge.f32.partialorder %v456_v52, 0.0  ;;  %v572_v58 = vmul.f32 0.2, %v456_v52  ;;  %650 = vst.msk [vmem:[%s937_s28 + $0xd8] sm:$0xff] %vm622_vm3, %v617_v57  ;;  %v599_v62 = vsel %vm535_vm11, %v435_v47, %v567_v55  ;;  %v448_v0 = vadd.f32 %v928_v22, %v447_v54  ;;  %v810_v2 = vpop.f32.mrb[14].mxu1  ;;  %v450_v3 = vpop.f32.mrb[15].mxu0 }
 0x101   : > { %v615_v63 = vsel %vm551_vm12, %v499_v48, %v583_v56  ;;  %v512_v1 = vadd.f32 %v928_v22, %v511_v60  ;;  %632 = vst.msk [vmem:[%s937_s28 + $0x48] sm:$0xff] %vm622_vm3, %v599_v62  ;;  %vm556_vm14 = vcmp.ge.f32.partialorder %v520_v59, 0.0  ;;  %v588_v5 = vmul.f32 0.2, %v520_v59  ;;  %v514_v7 = vpop.f32.mrb[15].mxu1 }
 0x102   : > { %648 = vst.msk [vmem:[%s937_s28 + $0xc8] sm:$0xff] %vm622_vm3, %v615_v63  ;;  %v604_v4 = vsel %vm540_vm13, %v456_v52, %v572_v58  ;;  %v459_v6 = vadd.f32 %v794_v61, %v928_v22  ;;  %vm538_vm15 = vcmp.ge.f32.partialorder %v448_v0, 0.0  ;;  %v570_v8 = vmul.f32 0.2, %v448_v0 }
 0x103   : > { %637 = vst.msk [vmem:[%s937_s28 + $0x70] sm:$0xff] %vm622_vm3, %v604_v4  ;;  %vm554_vm0 = vcmp.ge.f32.partialorder %v512_v1, 0.0  ;;  %v586_v9 = vmul.f32 0.2, %v512_v1  ;;  %v620_v10 = vsel %vm556_vm14, %v520_v59, %v588_v5  ;;  %v523_v12 = vadd.f32 %v810_v2, %v928_v22 }
 0x104   : > { %vm541_vm1 = vcmp.ge.f32.partialorder %v459_v6, 0.0  ;;  %v573_v11 = vmul.f32 0.2, %v459_v6  ;;  %653 = vst.msk [vmem:[%s937_s28 + $0xf0] sm:$0xff] %vm622_vm3, %v620_v10  ;;  %v602_v13 = vsel %vm538_vm15, %v448_v0, %v570_v8  ;;  %v451_v15 = vadd.f32 %v928_v22, %v450_v3 }
 0x105   : > { %v618_v14 = vsel %vm554_vm0, %v512_v1, %v586_v9  ;;  %v515_v16 = vadd.f32 %v928_v22, %v514_v7  ;;  %635 = vst.msk [vmem:[%s937_s28 + $0x60] sm:$0xff] %vm622_vm3, %v602_v13  ;;  %vm557_vm2 = vcmp.ge.f32.partialorder %v523_v12, 0.0  ;;  %v589_v18 = vmul.f32 0.2, %v523_v12 }
 0x106   : > { %651 = vst.msk [vmem:[%s937_s28 + $0xe0] sm:$0xff] %vm622_vm3, %v618_v14  ;;  %v605_v17 = vsel %vm541_vm1, %v459_v6, %v573_v11  ;;  %vm539_vm4 = vcmp.ge.f32.partialorder %v451_v15, 0.0  ;;  %v571_v19 = vmul.f32 0.2, %v451_v15 }
 0x107   : > { %638 = vst.msk [vmem:[%s937_s28 + $0x78] sm:$0xff] %vm622_vm3, %v605_v17  ;;  %vm555_vm5 = vcmp.ge.f32.partialorder %v515_v16, 0.0  ;;  %v587_v20 = vmul.f32 0.2, %v515_v16  ;;  %v621_v21 = vsel %vm557_vm2, %v523_v12, %v589_v18 }
 0x108   : > { %654 = vst.msk [vmem:[%s937_s28 + $0xf8] sm:$0xff] %vm622_vm3, %v621_v21  ;;  %v603_v23 = vsel %vm539_vm4, %v451_v15, %v571_v19 }
 0x109   : > { %v619_v24 = vsel %vm555_vm5, %v515_v16, %v587_v20  ;;  %636 = vst.msk [vmem:[%s937_s28 + $0x68] sm:$0xff] %vm622_vm3, %v603_v23 }
 0x10a   : > { %652 = vst.msk [vmem:[%s937_s28 + $0xe8] sm:$0xff] %vm622_vm3, %v619_v24 }
 0x10b PF: > { %s13_s12 = sadd.s32 1, %s848_s12  }
 0x10c   : > { %p10_p4 = scmp.ge.s32.totalorder %s13_s12, 20  }
 0x10e   :  { %12 = sbr.rel (!%p10_p4) target bundleno = 1 (0x1), region = 62 }

// kernel: discriminator_forward.6
= control target key start
LH: loop header
LB: loop body
LE: loop exit
PB: predicated region body
PF: predicated region fallthrough
CT: control target
= control target key end

     0   :  { %s910_s12 = smov 0   ;;  %s1083_s0 = inlined_call_operand.vmem [shape: bf16[1280,72], index: 0, kind: input, shape index: {}]   ;;  %s1084_s1 = inlined_call_operand.vmem [shape: bf16[72,8], index: 1, kind: input, shape index: {}]   ;;  %s1085_s2 = inlined_call_operand.vmem [shape: f32[1,8], index: 2, kind: input, shape index: {}]   ;;  %s1086_s3 = inlined_call_operand.vmem [shape: f32[1280,8], index: 3, kind: output, shape index: {}]  }
   0x1 LB: > { %s729_s13 = sadd.s32 4294967295, %s888_s12   ;;  %p733_p0 = scmp.ge.s32.totalorder %s888_s12, 1  ;;  %s888_s12 = sphi %s910_s12, %s13_s12  }
   0x2   : > { %p138_p1 = scmp.lt.s32.totalorder %s888_s12, 6 }
   0x4   : > { %p139_p2 = pnand %p733_p0, %p138_p1 }
   0x5   : > { %v861_v0 = vld [vmem:[%s1084_s1] sm:$0xff] (!%p139_p2)   ;;  %v862_v1 = vld [vmem:[%s1084_s1 + $0x8] sm:$0xff] (!%p139_p2)   ;;  %s734_s18 = sshll.u32 (!%p139_p2), %s729_s13, 5  ;;  %v863_v2 = vld [vmem:[%s1084_s1 + $0x10] sm:$0xff] (!%p139_p2)   ;;  %vm330_vm0 = vcmask (!%p139_p2), 588800   ;;  %vm379_vm1 = vcmask (!%p139_p2), 1043456  }
   0x6   : > { %142 = sbr.rel (%p139_p2) target bundleno = 275 (0x113), region = 32  ;;  %799 = vmatprep.subr.bf16.mxu0 (!%p139_p2), %v861_v0  ;;  %841 = vmatprep.subr.bf16.mxu1 (!%p139_p2), %v861_v0  ;;  %p163_p3 = scmp.lt.s32.totalorder (!%p139_p2), %s734_s18, 159  ;;  %v864_v3 = vld [vmem:[%s1084_s1 + $0x18] sm:$0xff] (!%p139_p2)   ;;  %v865_v6 = vld [vmem:[%s1084_s1 + $0x20] ss:$0 sps:$4 sm:$0xff] (!%p139_p2)   ;;  %vm640_vm2 = vcmask (!%p139_p2), 64512  }
   0x7   : > { %800 = vmatpush3.bf16.msra.mxu0 (!%p139_p2), %v861_v0  ;;  %846 = vmatpush3.bf16.msra.mxu1 (!%p139_p2), %v861_v0  ;;  %v381_v7 = vsel (!%p139_p2), %vm379_vm1, %v865_v6, 0  ;;  %v976_v22 = vld [vmem:[%s1085_s2] ss:$0 sm:$0xff] (!%p139_p2) }
   0x8   : > { %801 = vmatprep.subr.bf16.mxu0 (!%p139_p2), %v862_v1  ;;  %842 = vmatprep.subr.bf16.mxu1 (!%p139_p2), %v862_v1 }
   0xb   : > { %802 = vmatpush3.bf16.msra.mxu0 (!%p139_p2), %v862_v1  ;;  %847 = vmatpush3.bf16.msra.mxu1 (!%p139_p2), %v862_v1 }
   0xc   : > { %803 = vmatprep.subr.bf16.mxu0 (!%p139_p2), %v863_v2  ;;  %843 = vmatprep.subr.bf16.mxu1 (!%p139_p2), %v863_v2 }
   0xd   : > { %s1088_s18 = smov (!%p163_p3, %s734_s18), 159 }
   0xe   : > { %s735_s21 = sshll.u32 %s1088_s18, 2  ;;  %s737_s4 = sshll.u32 %s1088_s18, 3 }
   0xf   : > { %s936_s26 = scalar_lea.vmem %s1083_s0, %s735_s21  ;;  %804 = vmatpush3.bf16.msra.mxu0 %v863_v2  ;;  %848 = vmatpush3.bf16.msra.mxu1 %v863_v2  ;;  %s986_s7 = scalar_lea.vmem %s1086_s3, %s737_s4 }
  0x10   : > { %v866_v4 = vld [vmem:[%s936_s26] sm:$0xff]   ;;  %805 = vmatprep.subr.bf16.mxu0 %v864_v3  ;;  %844 = vmatprep.subr.bf16.mxu1 %v864_v3  ;;  %v868_v8 = vld [vmem:[%s936_s26 + $0x8] sm:$0xff]   ;;  %v870_v10 = vld [vmem:[%s936_s26 + $0x10] sm:$0xff]  }
  0x11   : > { %v867_v5 = vld [vmem:[%s936_s26 + $0x40] sm:$0xff]   ;;  %809 = vmatprep.mubr.msk.bf16.mxu0 %vm330_vm0, %v866_v4  ;;  %v869_v9 = vld [vmem:[%s936_s26 + $0x48] sm:$0xff]   ;;  %v871_v11 = vld [vmem:[%s936_s26 + $0x50] sm:$0xff]  }
  0x12   : > { %825 = vmatprep.mubr.msk.bf16.mxu1 %vm330_vm0, %v867_v5  ;;  %v872_v12 = vld [vmem:[%s936_s26 + $0x18] sm:$0xff]   ;;  %v874_v14 = vld [vmem:[%s936_s26 + $0x20] sm:$0xff]   ;;  %v876_v16 = vld [vmem:[%s936_s26 + $0x28] sm:$0xff]  }
  0x13   : > { %806 = vmatpush3.bf16.msra.mxu0 %v864_v3  ;;  %849 = vmatpush3.bf16.msra.mxu1 %v864_v3  ;;  %v873_v13 = vld [vmem:[%s936_s26 + $0x58] sm:$0xff]   ;;  %v875_v15 = vld [vmem:[%s936_s26 + $0x60] sm:$0xff]   ;;  %v877_v17 = vld [vmem:[%s936_s26 + $0x68] sm:$0xff]  }
  0x14   : > { %851 = vmatprep.subr.msk.bf16.mxu0 %vm379_vm1, %v865_v6  ;;  %852 = vmatprep.subr.msk.bf16.mxu1 %vm379_vm1, %v865_v6  ;;  %v878_v18 = vld [vmem:[%s936_s26 + $0x30] sm:$0xff]   ;;  %v880_v20 = vld [vmem:[%s936_s26 + $0x38] sm:$0xff]  }
  0x15   : > { %v879_v19 = vld [vmem:[%s936_s26 + $0x70] sm:$0xff]   ;;  %v881_v21 = vld [vmem:[%s936_s26 + $0x78] sm:$0xff]  }
  0x17   : > { %808 = vmatpush3.bf16.msra.mxu0 %v381_v7  ;;  %850 = vmatpush3.bf16.msra.mxu1 %v381_v7 }
  0x1a   : > { %810 = vmatmul.mubr.msk.bf16.vlgmr.msra.gmra.mrb[0].mxu0 %vm330_vm0, %v868_v8  ;;  %826 = vmatmul.mubr.msk.bf16.vlgmr.msra.gmra.mrb[0].mxu1 %vm330_vm0, %v869_v9 }
  0x1b   : > { %813 = vmatprep.mubr.msk.bf16.mxu0 %vm330_vm0, %v870_v10  ;;  %829 = vmatprep.mubr.msk.bf16.mxu1 %vm330_vm0, %v871_v11 }
  0x22   : > { %814 = vmatmul.mubr.msk.bf16.gmra.mrb[4].mxu0 %vm330_vm0, %v872_v12  ;;  %830 = vmatmul.mubr.msk.bf16.gmra.mrb[4].mxu1 %vm330_vm0, %v873_v13 }
  0x23   : > { %817 = vmatprep.mubr.msk.bf16.mxu0 %vm330_vm0, %v874_v14  ;;  %833 = vmatprep.mubr.msk.bf16.mxu1 %vm330_vm0, %v875_v15 }
  0x2a   : > { %818 = vmatmul.mubr.msk.bf16.gmra.mrb[8].mxu0 %vm330_vm0, %v876_v16  ;;  %834 = vmatmul.mubr.msk.bf16.gmra.mrb[8].mxu1 %vm330_vm0, %v877_v17 }
  0x2b   : > { %821 = vmatprep.mubr.msk.bf16.mxu0 %vm330_vm0, %v878_v18  ;;  %837 = vmatprep.mubr.msk.bf16.mxu1 %vm330_vm0, %v879_v19 }
  0x32   : > { %822 = vmatmul.mubr.msk.bf16.gmra.mrb[12].mxu0 %vm330_vm0, %v880_v20  ;;  %838 = vmatmul.mubr.msk.bf16.gmra.mrb[12].mxu1 %vm330_vm0, %v881_v21 }
  0xed   : > { %v811_v23 = vpop.f32.mrb[0].mxu0  ;;  %v827_v24 = vpop.f32.mrb[0].mxu1 }
  0xee   : > { %v426_v25 = vadd.f32 %v811_v23, %v976_v22  ;;  %v490_v26 = vadd.f32 %v827_v24, %v976_v22  ;;  %v417_v27 = vpop.f32.mrb[1].mxu0  ;;  %v481_v28 = vpop.f32.mrb[1].mxu1 }
  0xef   : > { %v418_v29 = vadd.f32 %v976_v22, %v417_v27  ;;  %v482_v30 = vadd.f32 %v976_v22, %v481_v28  ;;  %v812_v31 = vpop.f32.mrb[2].mxu0  ;;  %v828_v32 = vpop.f32.mrb[2].mxu1 }
  0xf0   : > { %vm546_vm3 = vcmp.ge.f32.partialorder %v426_v25, 0.0  ;;  %v578_v33 = vmul.f32 0.2, %v426_v25  ;;  %vm562_vm4 = vcmp.ge.f32.partialorder %v490_v26, 0.0  ;;  %v594_v34 = vmul.f32 0.2, %v490_v26 }
  0xf1   : > { %vm544_vm5 = vcmp.ge.f32.partialorder %v418_v29, 0.0  ;;  %v576_v35 = vmul.f32 0.2, %v418_v29  ;;  %vm560_vm6 = vcmp.ge.f32.partialorder %v482_v30, 0.0  ;;  %v592_v36 = vmul.f32 0.2, %v482_v30 }
  0xf2   : > { %v610_v37 = vsel %vm546_vm3, %v426_v25, %v578_v33  ;;  %v626_v38 = vsel %vm562_vm4, %v490_v26, %v594_v34  ;;  %v429_v39 = vadd.f32 %v812_v31, %v976_v22  ;;  %v493_v40 = vadd.f32 %v828_v32, %v976_v22  ;;  %v420_v41 = vpop.f32.mrb[3].mxu0  ;;  %v484_v42 = vpop.f32.mrb[3].mxu1 }
  0xf3   : > { %643 = vst.msk [vmem:[%s986_s7 + $0x10] sm:$0xff] %vm640_vm2, %v610_v37  ;;  %659 = vst.msk [vmem:[%s986_s7 + $0x90] sm:$0xff] %vm640_vm2, %v626_v38  ;;  %v608_v43 = vsel %vm544_vm5, %v418_v29, %v576_v35  ;;  %v624_v44 = vsel %vm560_vm6, %v482_v30, %v592_v36  ;;  %v421_v45 = vadd.f32 %v976_v22, %v420_v41 }
  0xf4   : > { %v485_v46 = vadd.f32 %v976_v22, %v484_v42  ;;  %641 = vst.msk [vmem:[%s986_s7] sm:$0xff] %vm640_vm2, %v608_v43  ;;  %657 = vst.msk [vmem:[%s986_s7 + $0x80] sm:$0xff] %vm640_vm2, %v624_v44  ;;  %vm547_vm7 = vcmp.ge.f32.partialorder %v429_v39, 0.0  ;;  %v579_v47 = vmul.f32 0.2, %v429_v39  ;;  %vm563_vm8 = vcmp.ge.f32.partialorder %v493_v40, 0.0 }
  0xf5   : > { %v595_v48 = vmul.f32 0.2, %v493_v40  ;;  %vm545_vm9 = vcmp.ge.f32.partialorder %v421_v45, 0.0  ;;  %v577_v49 = vmul.f32 0.2, %v421_v45  ;;  %v815_v53 = vpop.f32.mrb[4].mxu0 }
  0xf6   : > { %vm561_vm10 = vcmp.ge.f32.partialorder %v485_v46, 0.0  ;;  %v593_v50 = vmul.f32 0.2, %v485_v46  ;;  %v611_v51 = vsel %vm547_vm7, %v429_v39, %v579_v47  ;;  %v831_v54 = vpop.f32.mrb[4].mxu1  ;;  %v442_v57 = vadd.f32 %v815_v53, %v976_v22  ;;  %v433_v59 = vpop.f32.mrb[5].mxu0 }
  0xf7   : > { %v627_v52 = vsel %vm563_vm8, %v493_v40, %v595_v48  ;;  %644 = vst.msk [vmem:[%s986_s7 + $0x18] sm:$0xff] %vm640_vm2, %v611_v51  ;;  %v609_v55 = vsel %vm545_vm9, %v421_v45, %v577_v49  ;;  %v506_v58 = vadd.f32 %v831_v54, %v976_v22  ;;  %v497_v60 = vpop.f32.mrb[5].mxu1  ;;  %v434_v61 = vadd.f32 %v976_v22, %v433_v59  ;;  %v816_v63 = vpop.f32.mrb[6].mxu0 }
  0xf8   : > { %660 = vst.msk [vmem:[%s986_s7 + $0x98] sm:$0xff] %vm640_vm2, %v627_v52  ;;  %v625_v56 = vsel %vm561_vm10, %v485_v46, %v593_v50  ;;  %642 = vst.msk [vmem:[%s986_s7 + $0x8] sm:$0xff] %vm640_vm2, %v609_v55  ;;  %v498_v62 = vadd.f32 %v976_v22, %v497_v60  ;;  %v832_v0 = vpop.f32.mrb[6].mxu1  ;;  %vm550_vm11 = vcmp.ge.f32.partialorder %v442_v57, 0.0  ;;  %v582_v1 = vmul.f32 0.2, %v442_v57 }
  0xf9   : > { %658 = vst.msk [vmem:[%s986_s7 + $0x88] sm:$0xff] %vm640_vm2, %v625_v56  ;;  %vm566_vm12 = vcmp.ge.f32.partialorder %v506_v58, 0.0  ;;  %v598_v2 = vmul.f32 0.2, %v506_v58  ;;  %vm548_vm13 = vcmp.ge.f32.partialorder %v434_v61, 0.0  ;;  %v445_v7 = vadd.f32 %v816_v63, %v976_v22  ;;  %v436_v9 = vpop.f32.mrb[7].mxu0 }
  0xfa   : > { %v580_v3 = vmul.f32 0.2, %v434_v61  ;;  %vm564_vm14 = vcmp.ge.f32.partialorder %v498_v62, 0.0  ;;  %v596_v4 = vmul.f32 0.2, %v498_v62  ;;  %v614_v5 = vsel %vm550_vm11, %v442_v57, %v582_v1  ;;  %v500_v10 = vpop.f32.mrb[7].mxu1 }
  0xfb   : > { %v630_v6 = vsel %vm566_vm12, %v506_v58, %v598_v2  ;;  %v509_v8 = vadd.f32 %v832_v0, %v976_v22  ;;  %647 = vst.msk [vmem:[%s986_s7 + $0x30] sm:$0xff] %vm640_vm2, %v614_v5  ;;  %v437_v13 = vadd.f32 %v976_v22, %v436_v9  ;;  %v501_v14 = vadd.f32 %v976_v22, %v500_v10 }
  0xfc   : > { %663 = vst.msk [vmem:[%s986_s7 + $0xb0] sm:$0xff] %vm640_vm2, %v630_v6  ;;  %v612_v11 = vsel %vm548_vm13, %v434_v61, %v580_v3  ;;  %v628_v12 = vsel %vm564_vm14, %v498_v62, %v596_v4  ;;  %vm551_vm15 = vcmp.ge.f32.partialorder %v445_v7, 0.0  ;;  %v583_v15 = vmul.f32 0.2, %v445_v7 }
  0xfd   : > { %645 = vst.msk [vmem:[%s986_s7 + $0x20] sm:$0xff] %vm640_vm2, %v612_v11  ;;  %661 = vst.msk [vmem:[%s986_s7 + $0xa0] sm:$0xff] %vm640_vm2, %v628_v12  ;;  %vm567_vm0 = vcmp.ge.f32.partialorder %v509_v8, 0.0  ;;  %v599_v16 = vmul.f32 0.2, %v509_v8  ;;  %vm549_vm1 = vcmp.ge.f32.partialorder %v437_v13, 0.0 }
  0xfe   : > { %v581_v17 = vmul.f32 0.2, %v437_v13  ;;  %vm565_vm3 = vcmp.ge.f32.partialorder %v501_v14, 0.0  ;;  %v597_v18 = vmul.f32 0.2, %v501_v14  ;;  %v615_v19 = vsel %vm551_vm15, %v445_v7, %v583_v15  ;;  %v819_v21 = vpop.f32.mrb[8].mxu0 }
  0xff   : > { %v631_v20 = vsel %vm567_vm0, %v509_v8, %v599_v16  ;;  %v835_v23 = vpop.f32.mrb[8].mxu1  ;;  %648 = vst.msk [vmem:[%s986_s7 + $0x38] sm:$0xff] %vm640_vm2, %v615_v19  ;;  %v458_v26 = vadd.f32 %v819_v21, %v976_v22  ;;  %v449_v28 = vpop.f32.mrb[9].mxu0 }
 0x100   : > { %664 = vst.msk [vmem:[%s986_s7 + $0xb8] sm:$0xff] %vm640_vm2, %v631_v20  ;;  %v613_v24 = vsel %vm549_vm1, %v437_v13, %v581_v17  ;;  %v629_v25 = vsel %vm565_vm3, %v501_v14, %v597_v18  ;;  %v522_v27 = vadd.f32 %v835_v23, %v976_v22  ;;  %v513_v29 = vpop.f32.mrb[9].mxu1  ;;  %v450_v30 = vadd.f32 %v976_v22, %v449_v28  ;;  %v820_v32 = vpop.f32.mrb[10].mxu0 }
 0x101   : > { %646 = vst.msk [vmem:[%s986_s7 + $0x28] sm:$0xff] %vm640_vm2, %v613_v24  ;;  %662 = vst.msk [vmem:[%s986_s7 + $0xa8] sm:$0xff] %vm640_vm2, %v629_v25  ;;  %v514_v31 = vadd.f32 %v976_v22, %v513_v29  ;;  %v836_v33 = vpop.f32.mrb[10].mxu1  ;;  %vm554_vm4 = vcmp.ge.f32.partialorder %v458_v26, 0.0  ;;  %v586_v34 = vmul.f32 0.2, %v458_v26  ;;  %v461_v40 = vadd.f32 %v820_v32, %v976_v22 }
 0x102   : > { %vm570_vm5 = vcmp.ge.f32.partialorder %v522_v27, 0.0  ;;  %v602_v35 = vmul.f32 0.2, %v522_v27  ;;  %vm552_vm6 = vcmp.ge.f32.partialorder %v450_v30, 0.0  ;;  %v584_v36 = vmul.f32 0.2, %v450_v30 }
 0x103   : > { %vm568_vm7 = vcmp.ge.f32.partialorder %v514_v31, 0.0  ;;  %v600_v37 = vmul.f32 0.2, %v514_v31  ;;  %v618_v38 = vsel %vm554_vm4, %v458_v26, %v586_v34  ;;  %v525_v41 = vadd.f32 %v836_v33, %v976_v22  ;;  %v452_v42 = vpop.f32.mrb[11].mxu0  ;;  %v516_v43 = vpop.f32.mrb[11].mxu1 }
 0x104   : > { %v634_v39 = vsel %vm570_vm5, %v522_v27, %v602_v35  ;;  %651 = vst.msk [vmem:[%s986_s7 + $0x50] sm:$0xff] %vm640_vm2, %v618_v38  ;;  %v616_v44 = vsel %vm552_vm6, %v450_v30, %v584_v36  ;;  %v453_v46 = vadd.f32 %v976_v22, %v452_v42  ;;  %v517_v47 = vadd.f32 %v976_v22, %v516_v43 }
 0x105   : > { %667 = vst.msk [vmem:[%s986_s7 + $0xd0] sm:$0xff] %vm640_vm2, %v634_v39  ;;  %v632_v45 = vsel %vm568_vm7, %v514_v31, %v600_v37  ;;  %v823_v48 = vpop.f32.mrb[12].mxu0  ;;  %v839_v49 = vpop.f32.mrb[12].mxu1  ;;  %649 = vst.msk [vmem:[%s986_s7 + $0x40] sm:$0xff] %vm640_vm2, %v616_v44  ;;  %vm555_vm8 = vcmp.ge.f32.partialorder %v461_v40, 0.0  ;;  %vm571_vm9 = vcmp.ge.f32.partialorder %v525_v41, 0.0 }
 0x106   : > { %665 = vst.msk [vmem:[%s986_s7 + $0xc0] sm:$0xff] %vm640_vm2, %v632_v45  ;;  %v587_v50 = vmul.f32 0.2, %v461_v40  ;;  %v603_v51 = vmul.f32 0.2, %v525_v41  ;;  %vm553_vm10 = vcmp.ge.f32.partialorder %v453_v46, 0.0  ;;  %v474_v56 = vadd.f32 %v823_v48, %v976_v22 }
 0x107   : > { %v585_v52 = vmul.f32 0.2, %v453_v46  ;;  %vm569_vm11 = vcmp.ge.f32.partialorder %v517_v47, 0.0  ;;  %v601_v53 = vmul.f32 0.2, %v517_v47  ;;  %v538_v57 = vadd.f32 %v839_v49, %v976_v22  ;;  %v465_v58 = vpop.f32.mrb[13].mxu0 }
 0x108   : > { %v619_v54 = vsel %vm555_vm8, %v461_v40, %v587_v50  ;;  %v635_v55 = vsel %vm571_vm9, %v525_v41, %v603_v51  ;;  %v529_v59 = vpop.f32.mrb[13].mxu1  ;;  %v466_v62 = vadd.f32 %v976_v22, %v465_v58  ;;  %v824_v0 = vpop.f32.mrb[14].mxu0  ;;  %vm558_vm12 = vcmp.ge.f32.partialorder %v474_v56, 0.0 }
 0x109   : > { %652 = vst.msk [vmem:[%s986_s7 + $0x58] sm:$0xff] %vm640_vm2, %v619_v54  ;;  %668 = vst.msk [vmem:[%s986_s7 + $0xd8] sm:$0xff] %vm640_vm2, %v635_v55  ;;  %v617_v60 = vsel %vm553_vm10, %v453_v46, %v585_v52  ;;  %v633_v61 = vsel %vm569_vm11, %v517_v47, %v601_v53  ;;  %v530_v63 = vadd.f32 %v976_v22, %v529_v59  ;;  %v840_v1 = vpop.f32.mrb[14].mxu1  ;;  %v590_v2 = vmul.f32 0.2, %v474_v56  ;;  %v468_v10 = vpop.f32.mrb[15].mxu0 }
 0x10a   : > { %650 = vst.msk [vmem:[%s986_s7 + $0x48] sm:$0xff] %vm640_vm2, %v617_v60  ;;  %666 = vst.msk [vmem:[%s986_s7 + $0xc8] sm:$0xff] %vm640_vm2, %v633_v61  ;;  %vm574_vm13 = vcmp.ge.f32.partialorder %v538_v57, 0.0  ;;  %v606_v3 = vmul.f32 0.2, %v538_v57  ;;  %vm556_vm14 = vcmp.ge.f32.partialorder %v466_v62, 0.0  ;;  %v477_v8 = vadd.f32 %v824_v0, %v976_v22 }
 0x10b   : > { %v588_v4 = vmul.f32 0.2, %v466_v62  ;;  %vm572_vm15 = vcmp.ge.f32.partialorder %v530_v63, 0.0  ;;  %v604_v5 = vmul.f32 0.2, %v530_v63  ;;  %v622_v6 = vsel %vm558_vm12, %v474_v56, %v590_v2  ;;  %v532_v11 = vpop.f32.mrb[15].mxu1 }
 0x10c   : > { %v638_v7 = vsel %vm574_vm13, %v538_v57, %v606_v3  ;;  %v541_v9 = vadd.f32 %v840_v1, %v976_v22  ;;  %655 = vst.msk [vmem:[%s986_s7 + $0x70] sm:$0xff] %vm640_vm2, %v622_v6  ;;  %v469_v14 = vadd.f32 %v976_v22, %v468_v10  ;;  %v533_v15 = vadd.f32 %v976_v22, %v532_v11 }
 0x10d   : > { %671 = vst.msk [vmem:[%s986_s7 + $0xf0] sm:$0xff] %vm640_vm2, %v638_v7  ;;  %v620_v12 = vsel %vm556_vm14, %v466_v62, %v588_v4  ;;  %v636_v13 = vsel %vm572_vm15, %v530_v63, %v604_v5  ;;  %vm559_vm0 = vcmp.ge.f32.partialorder %v477_v8, 0.0  ;;  %v591_v16 = vmul.f32 0.2, %v477_v8 }
 0x10e   : > { %653 = vst.msk [vmem:[%s986_s7 + $0x60] sm:$0xff] %vm640_vm2, %v620_v12  ;;  %669 = vst.msk [vmem:[%s986_s7 + $0xe0] sm:$0xff] %vm640_vm2, %v636_v13  ;;  %vm575_vm1 = vcmp.ge.f32.partialorder %v541_v9, 0.0  ;;  %v607_v17 = vmul.f32 0.2, %v541_v9  ;;  %vm557_vm3 = vcmp.ge.f32.partialorder %v469_v14, 0.0 }
 0x10f   : > { %v589_v18 = vmul.f32 0.2, %v469_v14  ;;  %vm573_vm4 = vcmp.ge.f32.partialorder %v533_v15, 0.0  ;;  %v605_v19 = vmul.f32 0.2, %v533_v15  ;;  %v623_v20 = vsel %vm559_vm0, %v477_v8, %v591_v16 }
 0x110   : > { %v639_v21 = vsel %vm575_vm1, %v541_v9, %v607_v17  ;;  %656 = vst.msk [vmem:[%s986_s7 + $0x78] sm:$0xff] %vm640_vm2, %v623_v20 }
 0x111   : > { %672 = vst.msk [vmem:[%s986_s7 + $0xf8] sm:$0xff] %vm640_vm2, %v639_v21  ;;  %v621_v22 = vsel %vm557_vm3, %v469_v14, %v589_v18  ;;  %v637_v23 = vsel %vm573_vm4, %v533_v15, %v605_v19 }
 0x112   : > { %654 = vst.msk [vmem:[%s986_s7 + $0x68] sm:$0xff] %vm640_vm2, %v621_v22  ;;  %670 = vst.msk [vmem:[%s986_s7 + $0xe8] sm:$0xff] %vm640_vm2, %v637_v23 }
 0x113 PF: > { %s13_s12 = sadd.s32 1, %s888_s12  }
 0x114   : > { %p10_p4 = scmp.ge.s32.totalorder %s13_s12, 7  }
 0x116   :  { %12 = sbr.rel (!%p10_p4) target bundleno = 1 (0x1), region = 62 }

// kernel: discriminator_forward.7
= control target key start
LH: loop header
LB: loop body
LE: loop exit
PB: predicated region body
PF: predicated region fallthrough
CT: control target
= control target key end

     0   :  { %s910_s12 = smov 0   ;;  %s1083_s0 = inlined_call_operand.vmem [shape: bf16[1280,72], index: 0, kind: input, shape index: {}]   ;;  %s1084_s1 = inlined_call_operand.vmem [shape: bf16[72,16], index: 1, kind: input, shape index: {}]   ;;  %s1085_s2 = inlined_call_operand.vmem [shape: f32[1,16], index: 2, kind: input, shape index: {}]   ;;  %s1086_s3 = inlined_call_operand.vmem [shape: f32[1280,16], index: 3, kind: output, shape index: {}]  }
   0x1 LB: > { %s729_s13 = sadd.s32 4294967295, %s888_s12   ;;  %p733_p0 = scmp.ge.s32.totalorder %s888_s12, 1  ;;  %s888_s12 = sphi %s910_s12, %s13_s12  }
   0x2   : > { %p138_p1 = scmp.lt.s32.totalorder %s888_s12, 6 }
   0x4   : > { %p139_p2 = pnand %p733_p0, %p138_p1 }
   0x5   : > { %v861_v0 = vld [vmem:[%s1084_s1] sm:$0xff] (!%p139_p2)   ;;  %v862_v1 = vld [vmem:[%s1084_s1 + $0x8] sm:$0xff] (!%p139_p2)   ;;  %s734_s18 = sshll.u32 (!%p139_p2), %s729_s13, 5  ;;  %v863_v2 = vld [vmem:[%s1084_s1 + $0x10] sm:$0xff] (!%p139_p2)   ;;  %vm330_vm0 = vcmask (!%p139_p2), 588800   ;;  %vm379_vm1 = vcmask (!%p139_p2), 1043456  }
   0x6   : > { %142 = sbr.rel (%p139_p2) target bundleno = 275 (0x113), region = 32  ;;  %799 = vmatprep.subr.bf16.mxu0 (!%p139_p2), %v861_v0  ;;  %841 = vmatprep.subr.bf16.mxu1 (!%p139_p2), %v861_v0  ;;  %p163_p3 = scmp.lt.s32.totalorder (!%p139_p2), %s734_s18, 159  ;;  %v864_v3 = vld [vmem:[%s1084_s1 + $0x18] sm:$0xff] (!%p139_p2)   ;;  %v865_v6 = vld [vmem:[%s1084_s1 + $0x20] ss:$0 sps:$4 sm:$0xff] (!%p139_p2)   ;;  %vm640_vm2 = vcmask (!%p139_p2), 130048  }
   0x7   : > { %800 = vmatpush3.bf16.msra.mxu0 (!%p139_p2), %v861_v0  ;;  %846 = vmatpush3.bf16.msra.mxu1 (!%p139_p2), %v861_v0  ;;  %v381_v7 = vsel (!%p139_p2), %vm379_vm1, %v865_v6, 0  ;;  %v976_v22 = vld [vmem:[%s1085_s2] ss:$0 sm:$0xff] (!%p139_p2) }
   0x8   : > { %801 = vmatprep.subr.bf16.mxu0 (!%p139_p2), %v862_v1  ;;  %842 = vmatprep.subr.bf16.mxu1 (!%p139_p2), %v862_v1 }
   0xb   : > { %802 = vmatpush3.bf16.msra.mxu0 (!%p139_p2), %v862_v1  ;;  %847 = vmatpush3.bf16.msra.mxu1 (!%p139_p2), %v862_v1 }
   0xc   : > { %803 = vmatprep.subr.bf16.mxu0 (!%p139_p2), %v863_v2  ;;  %843 = vmatprep.subr.bf16.mxu1 (!%p139_p2), %v863_v2 }
   0xd   : > { %s1088_s18 = smov (!%p163_p3, %s734_s18), 159 }
   0xe   : > { %s735_s21 = sshll.u32 %s1088_s18, 2  ;;  %s737_s4 = sshll.u32 %s1088_s18, 3 }
   0xf   : > { %s936_s26 = scalar_lea.vmem %s1083_s0, %s735_s21  ;;  %804 = vmatpush3.bf16.msra.mxu0 %v863_v2  ;;  %848 = vmatpush3.bf16.msra.mxu1 %v863_v2  ;;  %s986_s7 = scalar_lea.vmem %s1086_s3, %s737_s4 }
  0x10   : > { %v866_v4 = vld [vmem:[%s936_s26] sm:$0xff]   ;;  %805 = vmatprep.subr.bf16.mxu0 %v864_v3  ;;  %844 = vmatprep.subr.bf16.mxu1 %v864_v3  ;;  %v868_v8 = vld [vmem:[%s936_s26 + $0x8] sm:$0xff]   ;;  %v870_v10 = vld [vmem:[%s936_s26 + $0x10] sm:$0xff]  }
  0x11   : > { %v867_v5 = vld [vmem:[%s936_s26 + $0x40] sm:$0xff]   ;;  %809 = vmatprep.mubr.msk.bf16.mxu0 %vm330_vm0, %v866_v4  ;;  %v869_v9 = vld [vmem:[%s936_s26 + $0x48] sm:$0xff]   ;;  %v871_v11 = vld [vmem:[%s936_s26 + $0x50] sm:$0xff]  }
  0x12   : > { %825 = vmatprep.mubr.msk.bf16.mxu1 %vm330_vm0, %v867_v5  ;;  %v872_v12 = vld [vmem:[%s936_s26 + $0x18] sm:$0xff]   ;;  %v874_v14 = vld [vmem:[%s936_s26 + $0x20] sm:$0xff]   ;;  %v876_v16 = vld [vmem:[%s936_s26 + $0x28] sm:$0xff]  }
  0x13   : > { %806 = vmatpush3.bf16.msra.mxu0 %v864_v3  ;;  %849 = vmatpush3.bf16.msra.mxu1 %v864_v3  ;;  %v873_v13 = vld [vmem:[%s936_s26 + $0x58] sm:$0xff]   ;;  %v875_v15 = vld [vmem:[%s936_s26 + $0x60] sm:$0xff]   ;;  %v877_v17 = vld [vmem:[%s936_s26 + $0x68] sm:$0xff]  }
  0x14   : > { %851 = vmatprep.subr.msk.bf16.mxu0 %vm379_vm1, %v865_v6  ;;  %852 = vmatprep.subr.msk.bf16.mxu1 %vm379_vm1, %v865_v6  ;;  %v878_v18 = vld [vmem:[%s936_s26 + $0x30] sm:$0xff]   ;;  %v880_v20 = vld [vmem:[%s936_s26 + $0x38] sm:$0xff]  }
  0x15   : > { %v879_v19 = vld [vmem:[%s936_s26 + $0x70] sm:$0xff]   ;;  %v881_v21 = vld [vmem:[%s936_s26 + $0x78] sm:$0xff]  }
  0x17   : > { %808 = vmatpush3.bf16.msra.mxu0 %v381_v7  ;;  %850 = vmatpush3.bf16.msra.mxu1 %v381_v7 }
  0x1a   : > { %810 = vmatmul.mubr.msk.bf16.vlgmr.msra.gmra.mrb[0].mxu0 %vm330_vm0, %v868_v8  ;;  %826 = vmatmul.mubr.msk.bf16.vlgmr.msra.gmra.mrb[0].mxu1 %vm330_vm0, %v869_v9 }
  0x1b   : > { %813 = vmatprep.mubr.msk.bf16.mxu0 %vm330_vm0, %v870_v10  ;;  %829 = vmatprep.mubr.msk.bf16.mxu1 %vm330_vm0, %v871_v11 }
  0x22   : > { %814 = vmatmul.mubr.msk.bf16.gmra.mrb[4].mxu0 %vm330_vm0, %v872_v12  ;;  %830 = vmatmul.mubr.msk.bf16.gmra.mrb[4].mxu1 %vm330_vm0, %v873_v13 }
  0x23   : > { %817 = vmatprep.mubr.msk.bf16.mxu0 %vm330_vm0, %v874_v14  ;;  %833 = vmatprep.mubr.msk.bf16.mxu1 %vm330_vm0, %v875_v15 }
  0x2a   : > { %818 = vmatmul.mubr.msk.bf16.gmra.mrb[8].mxu0 %vm330_vm0, %v876_v16  ;;  %834 = vmatmul.mubr.msk.bf16.gmra.mrb[8].mxu1 %vm330_vm0, %v877_v17 }
  0x2b   : > { %821 = vmatprep.mubr.msk.bf16.mxu0 %vm330_vm0, %v878_v18  ;;  %837 = vmatprep.mubr.msk.bf16.mxu1 %vm330_vm0, %v879_v19 }
  0x32   : > { %822 = vmatmul.mubr.msk.bf16.gmra.mrb[12].mxu0 %vm330_vm0, %v880_v20  ;;  %838 = vmatmul.mubr.msk.bf16.gmra.mrb[12].mxu1 %vm330_vm0, %v881_v21 }
  0xed   : > { %v811_v23 = vpop.f32.mrb[0].mxu0  ;;  %v827_v24 = vpop.f32.mrb[0].mxu1 }
  0xee   : > { %v426_v25 = vadd.f32 %v811_v23, %v976_v22  ;;  %v490_v26 = vadd.f32 %v827_v24, %v976_v22  ;;  %v417_v27 = vpop.f32.mrb[1].mxu0  ;;  %v481_v28 = vpop.f32.mrb[1].mxu1 }
  0xef   : > { %v418_v29 = vadd.f32 %v976_v22, %v417_v27  ;;  %v482_v30 = vadd.f32 %v976_v22, %v481_v28  ;;  %v812_v31 = vpop.f32.mrb[2].mxu0  ;;  %v828_v32 = vpop.f32.mrb[2].mxu1 }
  0xf0   : > { %vm546_vm3 = vcmp.ge.f32.partialorder %v426_v25, 0.0  ;;  %v578_v33 = vmul.f32 0.2, %v426_v25  ;;  %vm562_vm4 = vcmp.ge.f32.partialorder %v490_v26, 0.0  ;;  %v594_v34 = vmul.f32 0.2, %v490_v26 }
  0xf1   : > { %vm544_vm5 = vcmp.ge.f32.partialorder %v418_v29, 0.0  ;;  %v576_v35 = vmul.f32 0.2, %v418_v29  ;;  %vm560_vm6 = vcmp.ge.f32.partialorder %v482_v30, 0.0  ;;  %v592_v36 = vmul.f32 0.2, %v482_v30 }
  0xf2   : > { %v610_v37 = vsel %vm546_vm3, %v426_v25, %v578_v33  ;;  %v626_v38 = vsel %vm562_vm4, %v490_v26, %v594_v34  ;;  %v429_v39 = vadd.f32 %v812_v31, %v976_v22  ;;  %v493_v40 = vadd.f32 %v828_v32, %v976_v22  ;;  %v420_v41 = vpop.f32.mrb[3].mxu0  ;;  %v484_v42 = vpop.f32.mrb[3].mxu1 }
  0xf3   : > { %643 = vst.msk [vmem:[%s986_s7 + $0x10] sm:$0xff] %vm640_vm2, %v610_v37  ;;  %659 = vst.msk [vmem:[%s986_s7 + $0x90] sm:$0xff] %vm640_vm2, %v626_v38  ;;  %v608_v43 = vsel %vm544_vm5, %v418_v29, %v576_v35  ;;  %v624_v44 = vsel %vm560_vm6, %v482_v30, %v592_v36  ;;  %v421_v45 = vadd.f32 %v976_v22, %v420_v41 }
  0xf4   : > { %v485_v46 = vadd.f32 %v976_v22, %v484_v42  ;;  %641 = vst.msk [vmem:[%s986_s7] sm:$0xff] %vm640_vm2, %v608_v43  ;;  %657 = vst.msk [vmem:[%s986_s7 + $0x80] sm:$0xff] %vm640_vm2, %v624_v44  ;;  %vm547_vm7 = vcmp.ge.f32.partialorder %v429_v39, 0.0  ;;  %v579_v47 = vmul.f32 0.2, %v429_v39  ;;  %vm563_vm8 = vcmp.ge.f32.partialorder %v493_v40, 0.0 }
  0xf5   : > { %v595_v48 = vmul.f32 0.2, %v493_v40  ;;  %vm545_vm9 = vcmp.ge.f32.partialorder %v421_v45, 0.0  ;;  %v577_v49 = vmul.f32 0.2, %v421_v45  ;;  %v815_v53 = vpop.f32.mrb[4].mxu0 }
  0xf6   : > { %vm561_vm10 = vcmp.ge.f32.partialorder %v485_v46, 0.0  ;;  %v593_v50 = vmul.f32 0.2, %v485_v46  ;;  %v611_v51 = vsel %vm547_vm7, %v429_v39, %v579_v47  ;;  %v831_v54 = vpop.f32.mrb[4].mxu1  ;;  %v442_v57 = vadd.f32 %v815_v53, %v976_v22  ;;  %v433_v59 = vpop.f32.mrb[5].mxu0 }
  0xf7   : > { %v627_v52 = vsel %vm563_vm8, %v493_v40, %v595_v48  ;;  %644 = vst.msk [vmem:[%s986_s7 + $0x18] sm:$0xff] %vm640_vm2, %v611_v51  ;;  %v609_v55 = vsel %vm545_vm9, %v421_v45, %v577_v49  ;;  %v506_v58 = vadd.f32 %v831_v54, %v976_v22  ;;  %v497_v60 = vpop.f32.mrb[5].mxu1  ;;  %v434_v61 = vadd.f32 %v976_v22, %v433_v59  ;;  %v816_v63 = vpop.f32.mrb[6].mxu0 }
  0xf8   : > { %660 = vst.msk [vmem:[%s986_s7 + $0x98] sm:$0xff] %vm640_vm2, %v627_v52  ;;  %v625_v56 = vsel %vm561_vm10, %v485_v46, %v593_v50  ;;  %642 = vst.msk [vmem:[%s986_s7 + $0x8] sm:$0xff] %vm640_vm2, %v609_v55  ;;  %v498_v62 = vadd.f32 %v976_v22, %v497_v60  ;;  %v832_v0 = vpop.f32.mrb[6].mxu1  ;;  %vm550_vm11 = vcmp.ge.f32.partialorder %v442_v57, 0.0  ;;  %v582_v1 = vmul.f32 0.2, %v442_v57 }
  0xf9   : > { %658 = vst.msk [vmem:[%s986_s7 + $0x88] sm:$0xff] %vm640_vm2, %v625_v56  ;;  %vm566_vm12 = vcmp.ge.f32.partialorder %v506_v58, 0.0  ;;  %v598_v2 = vmul.f32 0.2, %v506_v58  ;;  %vm548_vm13 = vcmp.ge.f32.partialorder %v434_v61, 0.0  ;;  %v445_v7 = vadd.f32 %v816_v63, %v976_v22  ;;  %v436_v9 = vpop.f32.mrb[7].mxu0 }
  0xfa   : > { %v580_v3 = vmul.f32 0.2, %v434_v61  ;;  %vm564_vm14 = vcmp.ge.f32.partialorder %v498_v62, 0.0  ;;  %v596_v4 = vmul.f32 0.2, %v498_v62  ;;  %v614_v5 = vsel %vm550_vm11, %v442_v57, %v582_v1  ;;  %v500_v10 = vpop.f32.mrb[7].mxu1 }
  0xfb   : > { %v630_v6 = vsel %vm566_vm12, %v506_v58, %v598_v2  ;;  %v509_v8 = vadd.f32 %v832_v0, %v976_v22  ;;  %647 = vst.msk [vmem:[%s986_s7 + $0x30] sm:$0xff] %vm640_vm2, %v614_v5  ;;  %v437_v13 = vadd.f32 %v976_v22, %v436_v9  ;;  %v501_v14 = vadd.f32 %v976_v22, %v500_v10 }
  0xfc   : > { %663 = vst.msk [vmem:[%s986_s7 + $0xb0] sm:$0xff] %vm640_vm2, %v630_v6  ;;  %v612_v11 = vsel %vm548_vm13, %v434_v61, %v580_v3  ;;  %v628_v12 = vsel %vm564_vm14, %v498_v62, %v596_v4  ;;  %vm551_vm15 = vcmp.ge.f32.partialorder %v445_v7, 0.0  ;;  %v583_v15 = vmul.f32 0.2, %v445_v7 }
  0xfd   : > { %645 = vst.msk [vmem:[%s986_s7 + $0x20] sm:$0xff] %vm640_vm2, %v612_v11  ;;  %661 = vst.msk [vmem:[%s986_s7 + $0xa0] sm:$0xff] %vm640_vm2, %v628_v12  ;;  %vm567_vm0 = vcmp.ge.f32.partialorder %v509_v8, 0.0  ;;  %v599_v16 = vmul.f32 0.2, %v509_v8  ;;  %vm549_vm1 = vcmp.ge.f32.partialorder %v437_v13, 0.0 }
  0xfe   : > { %v581_v17 = vmul.f32 0.2, %v437_v13  ;;  %vm565_vm3 = vcmp.ge.f32.partialorder %v501_v14, 0.0  ;;  %v597_v18 = vmul.f32 0.2, %v501_v14  ;;  %v615_v19 = vsel %vm551_vm15, %v445_v7, %v583_v15  ;;  %v819_v21 = vpop.f32.mrb[8].mxu0 }
  0xff   : > { %v631_v20 = vsel %vm567_vm0, %v509_v8, %v599_v16  ;;  %v835_v23 = vpop.f32.mrb[8].mxu1  ;;  %648 = vst.msk [vmem:[%s986_s7 + $0x38] sm:$0xff] %vm640_vm2, %v615_v19  ;;  %v458_v26 = vadd.f32 %v819_v21, %v976_v22  ;;  %v449_v28 = vpop.f32.mrb[9].mxu0 }
 0x100   : > { %664 = vst.msk [vmem:[%s986_s7 + $0xb8] sm:$0xff] %vm640_vm2, %v631_v20  ;;  %v613_v24 = vsel %vm549_vm1, %v437_v13, %v581_v17  ;;  %v629_v25 = vsel %vm565_vm3, %v501_v14, %v597_v18  ;;  %v522_v27 = vadd.f32 %v835_v23, %v976_v22  ;;  %v513_v29 = vpop.f32.mrb[9].mxu1  ;;  %v450_v30 = vadd.f32 %v976_v22, %v449_v28  ;;  %v820_v32 = vpop.f32.mrb[10].mxu0 }
 0x101   : > { %646 = vst.msk [vmem:[%s986_s7 + $0x28] sm:$0xff] %vm640_vm2, %v613_v24  ;;  %662 = vst.msk [vmem:[%s986_s7 + $0xa8] sm:$0xff] %vm640_vm2, %v629_v25  ;;  %v514_v31 = vadd.f32 %v976_v22, %v513_v29  ;;  %v836_v33 = vpop.f32.mrb[10].mxu1  ;;  %vm554_vm4 = vcmp.ge.f32.partialorder %v458_v26, 0.0  ;;  %v586_v34 = vmul.f32 0.2, %v458_v26  ;;  %v461_v40 = vadd.f32 %v820_v32, %v976_v22 }
 0x102   : > { %vm570_vm5 = vcmp.ge.f32.partialorder %v522_v27, 0.0  ;;  %v602_v35 = vmul.f32 0.2, %v522_v27  ;;  %vm552_vm6 = vcmp.ge.f32.partialorder %v450_v30, 0.0  ;;  %v584_v36 = vmul.f32 0.2, %v450_v30 }
 0x103   : > { %vm568_vm7 = vcmp.ge.f32.partialorder %v514_v31, 0.0  ;;  %v600_v37 = vmul.f32 0.2, %v514_v31  ;;  %v618_v38 = vsel %vm554_vm4, %v458_v26, %v586_v34  ;;  %v525_v41 = vadd.f32 %v836_v33, %v976_v22  ;;  %v452_v42 = vpop.f32.mrb[11].mxu0  ;;  %v516_v43 = vpop.f32.mrb[11].mxu1 }
 0x104   : > { %v634_v39 = vsel %vm570_vm5, %v522_v27, %v602_v35  ;;  %651 = vst.msk [vmem:[%s986_s7 + $0x50] sm:$0xff] %vm640_vm2, %v618_v38  ;;  %v616_v44 = vsel %vm552_vm6, %v450_v30, %v584_v36  ;;  %v453_v46 = vadd.f32 %v976_v22, %v452_v42  ;;  %v517_v47 = vadd.f32 %v976_v22, %v516_v43 }
 0x105   : > { %667 = vst.msk [vmem:[%s986_s7 + $0xd0] sm:$0xff] %vm640_vm2, %v634_v39  ;;  %v632_v45 = vsel %vm568_vm7, %v514_v31, %v600_v37  ;;  %v823_v48 = vpop.f32.mrb[12].mxu0  ;;  %v839_v49 = vpop.f32.mrb[12].mxu1  ;;  %649 = vst.msk [vmem:[%s986_s7 + $0x40] sm:$0xff] %vm640_vm2, %v616_v44  ;;  %vm555_vm8 = vcmp.ge.f32.partialorder %v461_v40, 0.0  ;;  %vm571_vm9 = vcmp.ge.f32.partialorder %v525_v41, 0.0 }
 0x106   : > { %665 = vst.msk [vmem:[%s986_s7 + $0xc0] sm:$0xff] %vm640_vm2, %v632_v45  ;;  %v587_v50 = vmul.f32 0.2, %v461_v40  ;;  %v603_v51 = vmul.f32 0.2, %v525_v41  ;;  %vm553_vm10 = vcmp.ge.f32.partialorder %v453_v46, 0.0  ;;  %v474_v56 = vadd.f32 %v823_v48, %v976_v22 }
 0x107   : > { %v585_v52 = vmul.f32 0.2, %v453_v46  ;;  %vm569_vm11 = vcmp.ge.f32.partialorder %v517_v47, 0.0  ;;  %v601_v53 = vmul.f32 0.2, %v517_v47  ;;  %v538_v57 = vadd.f32 %v839_v49, %v976_v22  ;;  %v465_v58 = vpop.f32.mrb[13].mxu0 }
 0x108   : > { %v619_v54 = vsel %vm555_vm8, %v461_v40, %v587_v50  ;;  %v635_v55 = vsel %vm571_vm9, %v525_v41, %v603_v51  ;;  %v529_v59 = vpop.f32.mrb[13].mxu1  ;;  %v466_v62 = vadd.f32 %v976_v22, %v465_v58  ;;  %v824_v0 = vpop.f32.mrb[14].mxu0  ;;  %vm558_vm12 = vcmp.ge.f32.partialorder %v474_v56, 0.0 }
 0x109   : > { %652 = vst.msk [vmem:[%s986_s7 + $0x58] sm:$0xff] %vm640_vm2, %v619_v54  ;;  %668 = vst.msk [vmem:[%s986_s7 + $0xd8] sm:$0xff] %vm640_vm2, %v635_v55  ;;  %v617_v60 = vsel %vm553_vm10, %v453_v46, %v585_v52  ;;  %v633_v61 = vsel %vm569_vm11, %v517_v47, %v601_v53  ;;  %v530_v63 = vadd.f32 %v976_v22, %v529_v59  ;;  %v840_v1 = vpop.f32.mrb[14].mxu1  ;;  %v590_v2 = vmul.f32 0.2, %v474_v56  ;;  %v468_v10 = vpop.f32.mrb[15].mxu0 }
 0x10a   : > { %650 = vst.msk [vmem:[%s986_s7 + $0x48] sm:$0xff] %vm640_vm2, %v617_v60  ;;  %666 = vst.msk [vmem:[%s986_s7 + $0xc8] sm:$0xff] %vm640_vm2, %v633_v61  ;;  %vm574_vm13 = vcmp.ge.f32.partialorder %v538_v57, 0.0  ;;  %v606_v3 = vmul.f32 0.2, %v538_v57  ;;  %vm556_vm14 = vcmp.ge.f32.partialorder %v466_v62, 0.0  ;;  %v477_v8 = vadd.f32 %v824_v0, %v976_v22 }
 0x10b   : > { %v588_v4 = vmul.f32 0.2, %v466_v62  ;;  %vm572_vm15 = vcmp.ge.f32.partialorder %v530_v63, 0.0  ;;  %v604_v5 = vmul.f32 0.2, %v530_v63  ;;  %v622_v6 = vsel %vm558_vm12, %v474_v56, %v590_v2  ;;  %v532_v11 = vpop.f32.mrb[15].mxu1 }
 0x10c   : > { %v638_v7 = vsel %vm574_vm13, %v538_v57, %v606_v3  ;;  %v541_v9 = vadd.f32 %v840_v1, %v976_v22  ;;  %655 = vst.msk [vmem:[%s986_s7 + $0x70] sm:$0xff] %vm640_vm2, %v622_v6  ;;  %v469_v14 = vadd.f32 %v976_v22, %v468_v10  ;;  %v533_v15 = vadd.f32 %v976_v22, %v532_v11 }
 0x10d   : > { %671 = vst.msk [vmem:[%s986_s7 + $0xf0] sm:$0xff] %vm640_vm2, %v638_v7  ;;  %v620_v12 = vsel %vm556_vm14, %v466_v62, %v588_v4  ;;  %v636_v13 = vsel %vm572_vm15, %v530_v63, %v604_v5  ;;  %vm559_vm0 = vcmp.ge.f32.partialorder %v477_v8, 0.0  ;;  %v591_v16 = vmul.f32 0.2, %v477_v8 }
 0x10e   : > { %653 = vst.msk [vmem:[%s986_s7 + $0x60] sm:$0xff] %vm640_vm2, %v620_v12  ;;  %669 = vst.msk [vmem:[%s986_s7 + $0xe0] sm:$0xff] %vm640_vm2, %v636_v13  ;;  %vm575_vm1 = vcmp.ge.f32.partialorder %v541_v9, 0.0  ;;  %v607_v17 = vmul.f32 0.2, %v541_v9  ;;  %vm557_vm3 = vcmp.ge.f32.partialorder %v469_v14, 0.0 }
 0x10f   : > { %v589_v18 = vmul.f32 0.2, %v469_v14  ;;  %vm573_vm4 = vcmp.ge.f32.partialorder %v533_v15, 0.0  ;;  %v605_v19 = vmul.f32 0.2, %v533_v15  ;;  %v623_v20 = vsel %vm559_vm0, %v477_v8, %v591_v16 }
 0x110   : > { %v639_v21 = vsel %vm575_vm1, %v541_v9, %v607_v17  ;;  %656 = vst.msk [vmem:[%s986_s7 + $0x78] sm:$0xff] %vm640_vm2, %v623_v20 }
 0x111   : > { %672 = vst.msk [vmem:[%s986_s7 + $0xf8] sm:$0xff] %vm640_vm2, %v639_v21  ;;  %v621_v22 = vsel %vm557_vm3, %v469_v14, %v589_v18  ;;  %v637_v23 = vsel %vm573_vm4, %v533_v15, %v605_v19 }
 0x112   : > { %654 = vst.msk [vmem:[%s986_s7 + $0x68] sm:$0xff] %vm640_vm2, %v621_v22  ;;  %670 = vst.msk [vmem:[%s986_s7 + $0xe8] sm:$0xff] %vm640_vm2, %v637_v23 }
 0x113 PF: > { %s13_s12 = sadd.s32 1, %s888_s12  }
 0x114   : > { %p10_p4 = scmp.ge.s32.totalorder %s13_s12, 7  }
 0x116   :  { %12 = sbr.rel (!%p10_p4) target bundleno = 1 (0x1), region = 62 }

// kernel: discriminator_forward.8
= control target key start
LH: loop header
LB: loop body
LE: loop exit
PB: predicated region body
PF: predicated region fallthrough
CT: control target
= control target key end

     0   :  { %s1011_s12 = smov 0   ;;  %s1215_s0 = inlined_call_operand.vmem [shape: bf16[512,144], index: 0, kind: input, shape index: {}]   ;;  %s1216_s1 = inlined_call_operand.vmem [shape: bf16[144,16], index: 1, kind: input, shape index: {}]   ;;  %s1217_s2 = inlined_call_operand.vmem [shape: f32[1,16], index: 2, kind: input, shape index: {}]   ;;  %s1218_s3 = inlined_call_operand.vmem [shape: f32[512,16], index: 3, kind: output, shape index: {}]  }
   0x1 LB: > { %s827_s13 = sadd.s32 4294967295, %s988_s12   ;;  %p831_p0 = scmp.ge.s32.totalorder %s988_s12, 1  ;;  %s988_s12 = sphi %s1011_s12, %s13_s12  }
   0x2   : > { %p139_p1 = scmp.lt.s32.totalorder %s988_s12, 3 }
   0x4   : > { %p140_p2 = pnand %p831_p0, %p139_p1 }
   0x5   : > { %v925_v0 = vld [vmem:[%s1216_s1] sm:$0xff] (!%p140_p2)   ;;  %v990_v1 = vmov (!%p140_p2), 0   ;;  %s832_s16 = sshll.u32 (!%p140_p2), %s827_s13, 5  ;;  %v926_v2 = vld [vmem:[%s1216_s1 + $0x8] sm:$0xff] (!%p140_p2)   ;;  %v927_v3 = vld [vmem:[%s1216_s1 + $0x10] sm:$0xff] (!%p140_p2)   ;;  %vm433_vm0 = vcmask (!%p140_p2), 130048  }
   0x6   : > { %143 = sbr.rel (%p140_p2) target bundleno = 320 (0x140), region = 32  ;;  %482 = vmatprep.subr.bf16.mxu0 (!%p140_p2), %v990_v1  ;;  %898 = vmatprep.subr.bf16.mxu1 (!%p140_p2), %v990_v1  ;;  %p165_p3 = scmp.lt.s32.totalorder (!%p140_p2), %s832_s16, 63  ;;  %v928_v4 = vld [vmem:[%s1216_s1 + $0x18] sm:$0xff] (!%p140_p2)   ;;  %v929_v7 = vld [vmem:[%s1216_s1 + $0x20] sm:$0xff] (!%p140_p2)   ;;  %v930_v8 = vld [vmem:[%s1216_s1 + $0x28] sm:$0xff] (!%p140_p2)  }
   0x7   : > { %483 = vmatpush1.bf16.msra.mxu0 (!%p140_p2), %v925_v0  ;;  %907 = vmatpush1.bf16.msra.mxu1 (!%p140_p2), %v925_v0  ;;  %v931_v9 = vld [vmem:[%s1216_s1 + $0x30] sm:$0xff] (!%p140_p2)   ;;  %v932_v10 = vld [vmem:[%s1216_s1 + $0x38] sm:$0xff] (!%p140_p2)   ;;  %v933_v11 = vld [vmem:[%s1216_s1 + $0x40] sm:$0xff] (!%p140_p2)  }
   0x8   : > { %484 = vmatprep.subr.bf16.mxu0 (!%p140_p2), %v990_v1  ;;  %899 = vmatprep.subr.bf16.mxu1 (!%p140_p2), %v990_v1  ;;  %v1107_v42 = vld [vmem:[%s1217_s2] ss:$0 sm:$0xff] (!%p140_p2) }
   0xb   : > { %485 = vmatpush1.bf16.msra.mxu0 (!%p140_p2), %v926_v2  ;;  %908 = vmatpush1.bf16.msra.mxu1 (!%p140_p2), %v926_v2 }
   0xc   : > { %486 = vmatprep.subr.bf16.mxu0 (!%p140_p2), %v990_v1  ;;  %900 = vmatprep.subr.bf16.mxu1 (!%p140_p2), %v990_v1 }
   0xd   : > { %s1220_s16 = smov (!%p165_p3, %s832_s16), 63 }
   0xe   : > { %s897_s21 = sshll.u32 %s1220_s16, 3 }
   0xf   : > { %s1036_s24 = scalar_lea.vmem %s1215_s0, %s897_s21  ;;  %487 = vmatpush1.bf16.msra.mxu0 %v927_v3  ;;  %909 = vmatpush1.bf16.msra.mxu1 %v927_v3  ;;  %s1116_s15 = scalar_lea.vmem %s1218_s3, %s897_s21 }
  0x10   : > { %v936_v5 = vld [vmem:[%s1036_s24 + $0x4] ss:$8 sps:$4 sm:$0xff]   ;;  %488 = vmatprep.subr.bf16.mxu0 %v990_v1  ;;  %901 = vmatprep.subr.bf16.mxu1 %v990_v1  ;;  %v934_v12 = vld [vmem:[%s1036_s24] ss:$8 sps:$4 sm:$0xff]   ;;  %v940_v14 = vld [vmem:[%s1036_s24 + $0x14] ss:$8 sps:$4 sm:$0xff]  }
  0x11   : > { %v939_v6 = vld [vmem:[%s1036_s24 + $0x84] ss:$8 sps:$4 sm:$0xff]   ;;  %879 = vmatprep.mubr.msk.bf16.mxu0 %vm433_vm0, %v936_v5  ;;  %v937_v13 = vld [vmem:[%s1036_s24 + $0x80] ss:$8 sps:$4 sm:$0xff]   ;;  %v942_v15 = vld [vmem:[%s1036_s24 + $0x94] ss:$8 sps:$4 sm:$0xff]  }
  0x12   : > { %887 = vmatprep.mubr.msk.bf16.mxu1 %vm433_vm0, %v939_v6  ;;  %v944_v16 = vld [vmem:[%s1036_s24 + $0x10] ss:$8 sps:$4 sm:$0xff]   ;;  %v946_v18 = vld [vmem:[%s1036_s24 + $0x24] ss:$8 sps:$4 sm:$0xff]   ;;  %v950_v20 = vld [vmem:[%s1036_s24 + $0x20] ss:$8 sps:$4 sm:$0xff]  }
  0x13   : > { %489 = vmatpush1.bf16.msra.mxu0 %v928_v4  ;;  %910 = vmatpush1.bf16.msra.mxu1 %v928_v4  ;;  %v945_v17 = vld [vmem:[%s1036_s24 + $0x90] ss:$8 sps:$4 sm:$0xff]   ;;  %v948_v19 = vld [vmem:[%s1036_s24 + $0xa4] ss:$8 sps:$4 sm:$0xff]   ;;  %v951_v21 = vld [vmem:[%s1036_s24 + $0xa0] ss:$8 sps:$4 sm:$0xff]  }
  0x14   : > { %490 = vmatprep.subr.bf16.mxu0 %v990_v1  ;;  %902 = vmatprep.subr.bf16.mxu1 %v990_v1  ;;  %v952_v22 = vld [vmem:[%s1036_s24 + $0x34] ss:$8 sps:$4 sm:$0xff]   ;;  %v956_v24 = vld [vmem:[%s1036_s24 + $0x30] ss:$8 sps:$4 sm:$0xff]   ;;  %v958_v26 = vld [vmem:[%s1036_s24 + $0x44] ss:$8 sps:$4 sm:$0xff]  }
  0x15   : > { %v954_v23 = vld [vmem:[%s1036_s24 + $0xb4] ss:$8 sps:$4 sm:$0xff]   ;;  %v957_v25 = vld [vmem:[%s1036_s24 + $0xb0] ss:$8 sps:$4 sm:$0xff]   ;;  %v960_v27 = vld [vmem:[%s1036_s24 + $0xc4] ss:$8 sps:$4 sm:$0xff]  }
  0x16   : > { %v962_v28 = vld [vmem:[%s1036_s24 + $0x40] ss:$8 sps:$4 sm:$0xff]   ;;  %v964_v30 = vld [vmem:[%s1036_s24 + $0x54] ss:$8 sps:$4 sm:$0xff]   ;;  %v968_v32 = vld [vmem:[%s1036_s24 + $0x50] ss:$8 sps:$4 sm:$0xff]  }
  0x17   : > { %491 = vmatpush1.bf16.msra.mxu0 %v929_v7  ;;  %911 = vmatpush1.bf16.msra.mxu1 %v929_v7  ;;  %v963_v29 = vld [vmem:[%s1036_s24 + $0xc0] ss:$8 sps:$4 sm:$0xff]   ;;  %v966_v31 = vld [vmem:[%s1036_s24 + $0xd4] ss:$8 sps:$4 sm:$0xff]   ;;  %v969_v33 = vld [vmem:[%s1036_s24 + $0xd0] ss:$8 sps:$4 sm:$0xff]  }
  0x18   : > { %492 = vmatprep.subr.bf16.mxu0 %v990_v1  ;;  %903 = vmatprep.subr.bf16.mxu1 %v990_v1  ;;  %v970_v34 = vld [vmem:[%s1036_s24 + $0x64] ss:$8 sps:$4 sm:$0xff]   ;;  %v974_v36 = vld [vmem:[%s1036_s24 + $0x60] ss:$8 sps:$4 sm:$0xff]   ;;  %v976_v38 = vld [vmem:[%s1036_s24 + $0x74] ss:$8 sps:$4 sm:$0xff]  }
  0x19   : > { %v972_v35 = vld [vmem:[%s1036_s24 + $0xe4] ss:$8 sps:$4 sm:$0xff]   ;;  %v975_v37 = vld [vmem:[%s1036_s24 + $0xe0] ss:$8 sps:$4 sm:$0xff]   ;;  %v978_v39 = vld [vmem:[%s1036_s24 + $0xf4] ss:$8 sps:$4 sm:$0xff]  }
  0x1a   : > { %v980_v40 = vld [vmem:[%s1036_s24 + $0x70] ss:$8 sps:$4 sm:$0xff]  }
  0x1b   : > { %493 = vmatpush1.bf16.msra.mxu0 %v930_v8  ;;  %912 = vmatpush1.bf16.msra.mxu1 %v930_v8  ;;  %v981_v41 = vld [vmem:[%s1036_s24 + $0xf0] ss:$8 sps:$4 sm:$0xff]  }
  0x1c   : > { %494 = vmatprep.subr.bf16.mxu0 %v990_v1  ;;  %904 = vmatprep.subr.bf16.mxu1 %v990_v1 }
  0x1f   : > { %495 = vmatpush1.bf16.msra.mxu0 %v931_v9  ;;  %913 = vmatpush1.bf16.msra.mxu1 %v931_v9 }
  0x20   : > { %496 = vmatprep.subr.bf16.mxu0 %v990_v1  ;;  %905 = vmatprep.subr.bf16.mxu1 %v990_v1 }
  0x23   : > { %497 = vmatpush1.bf16.msra.mxu0 %v932_v10  ;;  %914 = vmatpush1.bf16.msra.mxu1 %v932_v10 }
  0x24   : > { %498 = vmatprep.subr.bf16.mxu0 %v990_v1  ;;  %906 = vmatprep.subr.bf16.mxu1 %v990_v1 }
  0x27   : > { %499 = vmatpush1.bf16.msra.mxu0 %v933_v11  ;;  %915 = vmatpush1.bf16.msra.mxu1 %v933_v11 }
  0x2a   : > { %515 = vmatmul.mubr.bf16.vlgmr.msra.gmra.mrb[0].mxu0 %v934_v12  ;;  %579 = vmatmul.mubr.bf16.vlgmr.msra.gmra.mrb[0].mxu1 %v937_v13 }
  0x2b   : > { %880 = vmatprep.mubr.msk.bf16.mxu0 %vm433_vm0, %v940_v14  ;;  %888 = vmatprep.mubr.msk.bf16.mxu1 %vm433_vm0, %v942_v15 }
  0x32   : > { %523 = vmatmul.mubr.bf16.gmra.mrb[4].mxu0 %v944_v16  ;;  %587 = vmatmul.mubr.bf16.gmra.mrb[4].mxu1 %v945_v17 }
  0x33   : > { %881 = vmatprep.mubr.msk.bf16.mxu0 %vm433_vm0, %v946_v18  ;;  %889 = vmatprep.mubr.msk.bf16.mxu1 %vm433_vm0, %v948_v19 }
  0x3a   : > { %531 = vmatmul.mubr.bf16.gmra.mrb[8].mxu0 %v950_v20  ;;  %595 = vmatmul.mubr.bf16.gmra.mrb[8].mxu1 %v951_v21 }
  0x3b   : > { %882 = vmatprep.mubr.msk.bf16.mxu0 %vm433_vm0, %v952_v22  ;;  %890 = vmatprep.mubr.msk.bf16.mxu1 %vm433_vm0, %v954_v23 }
  0x42   : > { %539 = vmatmul.mubr.bf16.gmra.mrb[12].mxu0 %v956_v24  ;;  %603 = vmatmul.mubr.bf16.gmra.mrb[12].mxu1 %v957_v25 }
  0x43   : > { %883 = vmatprep.mubr.msk.bf16.mxu0 %vm433_vm0, %v958_v26  ;;  %891 = vmatprep.mubr.msk.bf16.mxu1 %vm433_vm0, %v960_v27 }
  0x4a   : > { %547 = vmatmul.mubr.bf16.gmra.mrb[16].mxu0 %v962_v28  ;;  %611 = vmatmul.mubr.bf16.gmra.mrb[16].mxu1 %v963_v29 }
  0x4b   : > { %884 = vmatprep.mubr.msk.bf16.mxu0 %vm433_vm0, %v964_v30  ;;  %892 = vmatprep.mubr.msk.bf16.mxu1 %vm433_vm0, %v966_v31 }
  0x52   : > { %555 = vmatmul.mubr.bf16.gmra.mrb[20].mxu0 %v968_v32  ;;  %619 = vmatmul.mubr.bf16.gmra.mrb[20].mxu1 %v969_v33 }
  0x53   : > { %885 = vmatprep.mubr.msk.bf16.mxu0 %vm433_vm0, %v970_v34  ;;  %893 = vmatprep.mubr.msk.bf16.mxu1 %vm433_vm0, %v972_v35 }
  0x5a   : > { %563 = vmatmul.mubr.bf16.gmra.mrb[24].mxu0 %v974_v36  ;;  %627 = vmatmul.mubr.bf16.gmra.mrb[24].mxu1 %v975_v37 }
  0x5b   : > { %886 = vmatprep.mubr.msk.bf16.mxu0 %vm433_vm0, %v976_v38  ;;  %894 = vmatprep.mubr.msk.bf16.mxu1 %vm433_vm0, %v978_v39 }
  0x62   : > { %571 = vmatmul.mubr.bf16.gmra.mrb[28].mxu0 %v980_v40  ;;  %635 = vmatmul.mubr.bf16.gmra.mrb[28].mxu1 %v981_v41 }
  0xfd   : > { %v516_v43 = vpop.f32.mrb[0].mxu0  ;;  %v580_v44 = vpop.f32.mrb[0].mxu1 }
  0xfe   : > { %v517_v45 = vadd.f32 %v1107_v42, %v516_v43  ;;  %v581_v46 = vadd.f32 %v1107_v42, %v580_v44  ;;  %v518_v47 = vpop.f32.mrb[1].mxu0  ;;  %v582_v48 = vpop.f32.mrb[1].mxu1 }
  0xff   : > { %v519_v49 = vpop.f32.mrb[2].mxu0  ;;  %v583_v50 = vpop.f32.mrb[2].mxu1 }
 0x100   : > { %vm643_vm1 = vcmp.ge.f32.partialorder %v517_v45, 0.0  ;;  %v675_v51 = vmul.f32 0.2, %v517_v45  ;;  %vm659_vm2 = vcmp.ge.f32.partialorder %v581_v46, 0.0  ;;  %v691_v52 = vmul.f32 0.2, %v581_v46 }
 0x101   : > { %v520_v53 = vadd.f32 %v1107_v42, %v519_v49  ;;  %v584_v54 = vadd.f32 %v1107_v42, %v583_v50  ;;  %v521_v55 = vpop.f32.mrb[3].mxu0  ;;  %v585_v56 = vpop.f32.mrb[3].mxu1 }
 0x102   : > { %v707_v57 = vsel %vm643_vm1, %v517_v45, %v675_v51  ;;  %v723_v58 = vsel %vm659_vm2, %v581_v46, %v691_v52 }
 0x103   : > { %739 = vst.msk [vmem:[%s1116_s15] sm:$0xff] %vm433_vm0, %v707_v57  ;;  %755 = vst.msk [vmem:[%s1116_s15 + $0x80] sm:$0xff] %vm433_vm0, %v723_v58  ;;  %vm644_vm3 = vcmp.ge.f32.partialorder %v520_v53, 0.0  ;;  %v676_v59 = vmul.f32 0.2, %v520_v53  ;;  %vm660_vm4 = vcmp.ge.f32.partialorder %v584_v54, 0.0 }
 0x104   : > { %v692_v60 = vmul.f32 0.2, %v584_v54 }
 0x105   : > { %v708_v61 = vsel %vm644_vm3, %v520_v53, %v676_v59  ;;  %v524_v63 = vpop.f32.mrb[4].mxu0  ;;  %v588_v0 = vpop.f32.mrb[4].mxu1 }
 0x106   : > { %v724_v62 = vsel %vm660_vm4, %v584_v54, %v692_v60  ;;  %740 = vst.msk [vmem:[%s1116_s15 + $0x8] sm:$0xff] %vm433_vm0, %v708_v61  ;;  %v525_v1 = vadd.f32 %v1107_v42, %v524_v63  ;;  %v589_v2 = vadd.f32 %v1107_v42, %v588_v0  ;;  %v526_v3 = vpop.f32.mrb[5].mxu0  ;;  %v590_v4 = vpop.f32.mrb[5].mxu1 }
 0x107   : > { %756 = vst.msk [vmem:[%s1116_s15 + $0x88] sm:$0xff] %vm433_vm0, %v724_v62  ;;  %v527_v5 = vpop.f32.mrb[6].mxu0  ;;  %v591_v6 = vpop.f32.mrb[6].mxu1 }
 0x108   : > { %vm645_vm5 = vcmp.ge.f32.partialorder %v525_v1, 0.0  ;;  %v677_v7 = vmul.f32 0.2, %v525_v1  ;;  %vm661_vm6 = vcmp.ge.f32.partialorder %v589_v2, 0.0  ;;  %v693_v8 = vmul.f32 0.2, %v589_v2 }
 0x109   : > { %v528_v9 = vadd.f32 %v1107_v42, %v527_v5  ;;  %v592_v10 = vadd.f32 %v1107_v42, %v591_v6  ;;  %v529_v11 = vpop.f32.mrb[7].mxu0  ;;  %v593_v12 = vpop.f32.mrb[7].mxu1 }
 0x10a   : > { %v709_v13 = vsel %vm645_vm5, %v525_v1, %v677_v7  ;;  %v725_v14 = vsel %vm661_vm6, %v589_v2, %v693_v8 }
 0x10b   : > { %741 = vst.msk [vmem:[%s1116_s15 + $0x10] sm:$0xff] %vm433_vm0, %v709_v13  ;;  %757 = vst.msk [vmem:[%s1116_s15 + $0x90] sm:$0xff] %vm433_vm0, %v725_v14  ;;  %vm646_vm7 = vcmp.ge.f32.partialorder %v528_v9, 0.0  ;;  %v678_v15 = vmul.f32 0.2, %v528_v9  ;;  %vm662_vm8 = vcmp.ge.f32.partialorder %v592_v10, 0.0 }
 0x10c   : > { %v694_v16 = vmul.f32 0.2, %v592_v10 }
 0x10d   : > { %v710_v17 = vsel %vm646_vm7, %v528_v9, %v678_v15  ;;  %v532_v19 = vpop.f32.mrb[8].mxu0  ;;  %v596_v20 = vpop.f32.mrb[8].mxu1 }
 0x10e   : > { %v726_v18 = vsel %vm662_vm8, %v592_v10, %v694_v16  ;;  %742 = vst.msk [vmem:[%s1116_s15 + $0x18] sm:$0xff] %vm433_vm0, %v710_v17  ;;  %v533_v21 = vadd.f32 %v1107_v42, %v532_v19  ;;  %v597_v22 = vadd.f32 %v1107_v42, %v596_v20  ;;  %v534_v23 = vpop.f32.mrb[9].mxu0  ;;  %v598_v24 = vpop.f32.mrb[9].mxu1 }
 0x10f   : > { %758 = vst.msk [vmem:[%s1116_s15 + $0x98] sm:$0xff] %vm433_vm0, %v726_v18  ;;  %v535_v25 = vpop.f32.mrb[10].mxu0  ;;  %v599_v26 = vpop.f32.mrb[10].mxu1 }
 0x110   : > { %vm647_vm9 = vcmp.ge.f32.partialorder %v533_v21, 0.0  ;;  %v679_v27 = vmul.f32 0.2, %v533_v21  ;;  %vm663_vm10 = vcmp.ge.f32.partialorder %v597_v22, 0.0  ;;  %v695_v28 = vmul.f32 0.2, %v597_v22 }
 0x111   : > { %v536_v29 = vadd.f32 %v1107_v42, %v535_v25  ;;  %v600_v30 = vadd.f32 %v1107_v42, %v599_v26  ;;  %v537_v31 = vpop.f32.mrb[11].mxu0  ;;  %v601_v32 = vpop.f32.mrb[11].mxu1 }
 0x112   : > { %v711_v33 = vsel %vm647_vm9, %v533_v21, %v679_v27  ;;  %v727_v34 = vsel %vm663_vm10, %v597_v22, %v695_v28 }
 0x113   : > { %743 = vst.msk [vmem:[%s1116_s15 + $0x20] sm:$0xff] %vm433_vm0, %v711_v33  ;;  %759 = vst.msk [vmem:[%s1116_s15 + $0xa0] sm:$0xff] %vm433_vm0, %v727_v34  ;;  %vm648_vm11 = vcmp.ge.f32.partialorder %v536_v29, 0.0  ;;  %v680_v35 = vmul.f32 0.2, %v536_v29  ;;  %vm664_vm12 = vcmp.ge.f32.partialorder %v600_v30, 0.0 }
 0x114   : > { %v696_v36 = vmul.f32 0.2, %v600_v30 }
 0x115   : > { %v712_v37 = vsel %vm648_vm11, %v536_v29, %v680_v35  ;;  %v540_v39 = vpop.f32.mrb[12].mxu0  ;;  %v604_v40 = vpop.f32.mrb[12].mxu1 }
 0x116   : > { %v728_v38 = vsel %vm664_vm12, %v600_v30, %v696_v36  ;;  %744 = vst.msk [vmem:[%s1116_s15 + $0x28] sm:$0xff] %vm433_vm0, %v712_v37  ;;  %v541_v41 = vadd.f32 %v1107_v42, %v540_v39  ;;  %v605_v43 = vadd.f32 %v1107_v42, %v604_v40  ;;  %v542_v44 = vpop.f32.mrb[13].mxu0  ;;  %v606_v45 = vpop.f32.mrb[13].mxu1 }
 0x117   : > { %760 = vst.msk [vmem:[%s1116_s15 + $0xa8] sm:$0xff] %vm433_vm0, %v728_v38  ;;  %v543_v46 = vpop.f32.mrb[14].mxu0  ;;  %v607_v47 = vpop.f32.mrb[14].mxu1 }
 0x118   : > { %vm649_vm13 = vcmp.ge.f32.partialorder %v541_v41, 0.0  ;;  %v681_v48 = vmul.f32 0.2, %v541_v41  ;;  %vm665_vm14 = vcmp.ge.f32.partialorder %v605_v43, 0.0  ;;  %v697_v49 = vmul.f32 0.2, %v605_v43 }
 0x119   : > { %v544_v50 = vadd.f32 %v1107_v42, %v543_v46  ;;  %v608_v51 = vadd.f32 %v1107_v42, %v607_v47  ;;  %v545_v52 = vpop.f32.mrb[15].mxu0  ;;  %v609_v53 = vpop.f32.mrb[15].mxu1 }
 0x11a   : > { %v713_v54 = vsel %vm649_vm13, %v541_v41, %v681_v48  ;;  %v729_v55 = vsel %vm665_vm14, %v605_v43, %v697_v49 }
 0x11b   : > { %745 = vst.msk [vmem:[%s1116_s15 + $0x30] sm:$0xff] %vm433_vm0, %v713_v54  ;;  %761 = vst.msk [vmem:[%s1116_s15 + $0xb0] sm:$0xff] %vm433_vm0, %v729_v55  ;;  %vm650_vm15 = vcmp.ge.f32.partialorder %v544_v50, 0.0  ;;  %v682_v56 = vmul.f32 0.2, %v544_v50  ;;  %vm666_vm1 = vcmp.ge.f32.partialorder %v608_v51, 0.0 }
 0x11c   : > { %v698_v57 = vmul.f32 0.2, %v608_v51 }
 0x11d   : > { %v714_v58 = vsel %vm650_vm15, %v544_v50, %v682_v56  ;;  %v548_v60 = vpop.f32.mrb[16].mxu0  ;;  %v612_v61 = vpop.f32.mrb[16].mxu1 }
 0x11e   : > { %v730_v59 = vsel %vm666_vm1, %v608_v51, %v698_v57  ;;  %746 = vst.msk [vmem:[%s1116_s15 + $0x38] sm:$0xff] %vm433_vm0, %v714_v58  ;;  %v549_v62 = vadd.f32 %v1107_v42, %v548_v60  ;;  %v613_v63 = vadd.f32 %v1107_v42, %v612_v61  ;;  %v550_v0 = vpop.f32.mrb[17].mxu0  ;;  %v614_v1 = vpop.f32.mrb[17].mxu1 }
 0x11f   : > { %762 = vst.msk [vmem:[%s1116_s15 + $0xb8] sm:$0xff] %vm433_vm0, %v730_v59  ;;  %v551_v2 = vpop.f32.mrb[18].mxu0  ;;  %v615_v3 = vpop.f32.mrb[18].mxu1 }
 0x120   : > { %vm651_vm2 = vcmp.ge.f32.partialorder %v549_v62, 0.0  ;;  %v683_v4 = vmul.f32 0.2, %v549_v62  ;;  %vm667_vm3 = vcmp.ge.f32.partialorder %v613_v63, 0.0  ;;  %v699_v5 = vmul.f32 0.2, %v613_v63 }
 0x121   : > { %v552_v6 = vadd.f32 %v1107_v42, %v551_v2  ;;  %v616_v7 = vadd.f32 %v1107_v42, %v615_v3  ;;  %v553_v8 = vpop.f32.mrb[19].mxu0  ;;  %v617_v9 = vpop.f32.mrb[19].mxu1 }
 0x122   : > { %v715_v10 = vsel %vm651_vm2, %v549_v62, %v683_v4  ;;  %v731_v11 = vsel %vm667_vm3, %v613_v63, %v699_v5 }
 0x123   : > { %747 = vst.msk [vmem:[%s1116_s15 + $0x40] sm:$0xff] %vm433_vm0, %v715_v10  ;;  %763 = vst.msk [vmem:[%s1116_s15 + $0xc0] sm:$0xff] %vm433_vm0, %v731_v11  ;;  %vm652_vm4 = vcmp.ge.f32.partialorder %v552_v6, 0.0  ;;  %v684_v12 = vmul.f32 0.2, %v552_v6  ;;  %vm668_vm5 = vcmp.ge.f32.partialorder %v616_v7, 0.0 }
 0x124   : > { %v700_v13 = vmul.f32 0.2, %v616_v7 }
 0x125   : > { %v716_v14 = vsel %vm652_vm4, %v552_v6, %v684_v12  ;;  %v556_v16 = vpop.f32.mrb[20].mxu0  ;;  %v620_v17 = vpop.f32.mrb[20].mxu1 }
 0x126   : > { %v732_v15 = vsel %vm668_vm5, %v616_v7, %v700_v13  ;;  %748 = vst.msk [vmem:[%s1116_s15 + $0x48] sm:$0xff] %vm433_vm0, %v716_v14  ;;  %v557_v18 = vadd.f32 %v1107_v42, %v556_v16  ;;  %v621_v19 = vadd.f32 %v1107_v42, %v620_v17  ;;  %v558_v20 = vpop.f32.mrb[21].mxu0  ;;  %v622_v21 = vpop.f32.mrb[21].mxu1 }
 0x127   : > { %764 = vst.msk [vmem:[%s1116_s15 + $0xc8] sm:$0xff] %vm433_vm0, %v732_v15  ;;  %v559_v22 = vpop.f32.mrb[22].mxu0  ;;  %v623_v23 = vpop.f32.mrb[22].mxu1 }
 0x128   : > { %vm653_vm6 = vcmp.ge.f32.partialorder %v557_v18, 0.0  ;;  %v685_v24 = vmul.f32 0.2, %v557_v18  ;;  %vm669_vm7 = vcmp.ge.f32.partialorder %v621_v19, 0.0  ;;  %v701_v25 = vmul.f32 0.2, %v621_v19 }
 0x129   : > { %v560_v26 = vadd.f32 %v1107_v42, %v559_v22  ;;  %v624_v27 = vadd.f32 %v1107_v42, %v623_v23  ;;  %v561_v28 = vpop.f32.mrb[23].mxu0  ;;  %v625_v29 = vpop.f32.mrb[23].mxu1 }
 0x12a   : > { %v717_v30 = vsel %vm653_vm6, %v557_v18, %v685_v24  ;;  %v733_v31 = vsel %vm669_vm7, %v621_v19, %v701_v25 }
 0x12b   : > { %749 = vst.msk [vmem:[%s1116_s15 + $0x50] sm:$0xff] %vm433_vm0, %v717_v30  ;;  %765 = vst.msk [vmem:[%s1116_s15 + $0xd0] sm:$0xff] %vm433_vm0, %v733_v31  ;;  %vm654_vm8 = vcmp.ge.f32.partialorder %v560_v26, 0.0  ;;  %v686_v32 = vmul.f32 0.2, %v560_v26  ;;  %vm670_vm9 = vcmp.ge.f32.partialorder %v624_v27, 0.0 }
 0x12c   : > { %v702_v33 = vmul.f32 0.2, %v624_v27 }
 0x12d   : > { %v718_v34 = vsel %vm654_vm8, %v560_v26, %v686_v32  ;;  %v564_v36 = vpop.f32.mrb[24].mxu0  ;;  %v628_v37 = vpop.f32.mrb[24].mxu1 }
 0x12e   : > { %v734_v35 = vsel %vm670_vm9, %v624_v27, %v702_v33  ;;  %750 = vst.msk [vmem:[%s1116_s15 + $0x58] sm:$0xff] %vm433_vm0, %v718_v34  ;;  %v565_v38 = vadd.f32 %v1107_v42, %v564_v36  ;;  %v629_v39 = vadd.f32 %v1107_v42, %v628_v37  ;;  %v566_v40 = vpop.f32.mrb[25].mxu0  ;;  %v630_v41 = vpop.f32.mrb[25].mxu1 }
 0x12f   : > { %766 = vst.msk [vmem:[%s1116_s15 + $0xd8] sm:$0xff] %vm433_vm0, %v734_v35  ;;  %v567_v43 = vpop.f32.mrb[26].mxu0  ;;  %v631_v44 = vpop.f32.mrb[26].mxu1 }
 0x130   : > { %vm655_vm10 = vcmp.ge.f32.partialorder %v565_v38, 0.0  ;;  %v687_v45 = vmul.f32 0.2, %v565_v38  ;;  %vm671_vm11 = vcmp.ge.f32.partialorder %v629_v39, 0.0  ;;  %v703_v46 = vmul.f32 0.2, %v629_v39 }
 0x131   : > { %v568_v47 = vadd.f32 %v1107_v42, %v567_v43  ;;  %v632_v48 = vadd.f32 %v1107_v42, %v631_v44  ;;  %v569_v49 = vpop.f32.mrb[27].mxu0  ;;  %v633_v50 = vpop.f32.mrb[27].mxu1 }
 0x132   : > { %v719_v51 = vsel %vm655_vm10, %v565_v38, %v687_v45  ;;  %v735_v52 = vsel %vm671_vm11, %v629_v39, %v703_v46 }
 0x133   : > { %751 = vst.msk [vmem:[%s1116_s15 + $0x60] sm:$0xff] %vm433_vm0, %v719_v51  ;;  %767 = vst.msk [vmem:[%s1116_s15 + $0xe0] sm:$0xff] %vm433_vm0, %v735_v52  ;;  %vm656_vm12 = vcmp.ge.f32.partialorder %v568_v47, 0.0  ;;  %v688_v53 = vmul.f32 0.2, %v568_v47  ;;  %vm672_vm13 = vcmp.ge.f32.partialorder %v632_v48, 0.0 }
 0x134   : > { %v704_v54 = vmul.f32 0.2, %v632_v48 }
 0x135   : > { %v720_v55 = vsel %vm656_vm12, %v568_v47, %v688_v53  ;;  %v572_v57 = vpop.f32.mrb[28].mxu0  ;;  %v636_v58 = vpop.f32.mrb[28].mxu1 }
 0x136   : > { %v736_v56 = vsel %vm672_vm13, %v632_v48, %v704_v54  ;;  %752 = vst.msk [vmem:[%s1116_s15 + $0x68] sm:$0xff] %vm433_vm0, %v720_v55  ;;  %v573_v59 = vadd.f32 %v1107_v42, %v572_v57  ;;  %v637_v60 = vadd.f32 %v1107_v42, %v636_v58  ;;  %v574_v61 = vpop.f32.mrb[29].mxu0  ;;  %v638_v62 = vpop.f32.mrb[29].mxu1 }
 0x137   : > { %768 = vst.msk [vmem:[%s1116_s15 + $0xe8] sm:$0xff] %vm433_vm0, %v736_v56  ;;  %v575_v63 = vpop.f32.mrb[30].mxu0  ;;  %v639_v0 = vpop.f32.mrb[30].mxu1 }
 0x138   : > { %vm657_vm14 = vcmp.ge.f32.partialorder %v573_v59, 0.0  ;;  %v689_v1 = vmul.f32 0.2, %v573_v59  ;;  %vm673_vm15 = vcmp.ge.f32.partialorder %v637_v60, 0.0  ;;  %v705_v2 = vmul.f32 0.2, %v637_v60 }
 0x139   : > { %v576_v3 = vadd.f32 %v1107_v42, %v575_v63  ;;  %v640_v4 = vadd.f32 %v1107_v42, %v639_v0  ;;  %v577_v5 = vpop.f32.mrb[31].mxu0  ;;  %v641_v6 = vpop.f32.mrb[31].mxu1 }
 0x13a   : > { %v721_v7 = vsel %vm657_vm14, %v573_v59, %v689_v1  ;;  %v737_v8 = vsel %vm673_vm15, %v637_v60, %v705_v2 }
 0x13b   : > { %753 = vst.msk [vmem:[%s1116_s15 + $0x70] sm:$0xff] %vm433_vm0, %v721_v7  ;;  %769 = vst.msk [vmem:[%s1116_s15 + $0xf0] sm:$0xff] %vm433_vm0, %v737_v8  ;;  %vm658_vm1 = vcmp.ge.f32.partialorder %v576_v3, 0.0  ;;  %v690_v9 = vmul.f32 0.2, %v576_v3  ;;  %vm674_vm2 = vcmp.ge.f32.partialorder %v640_v4, 0.0 }
 0x13c   : > { %v706_v10 = vmul.f32 0.2, %v640_v4 }
 0x13d   : > { %v722_v11 = vsel %vm658_vm1, %v576_v3, %v690_v9 }
 0x13e   : > { %v738_v12 = vsel %vm674_vm2, %v640_v4, %v706_v10  ;;  %754 = vst.msk [vmem:[%s1116_s15 + $0x78] sm:$0xff] %vm433_vm0, %v722_v11 }
 0x13f   : > { %770 = vst.msk [vmem:[%s1116_s15 + $0xf8] sm:$0xff] %vm433_vm0, %v738_v12 }
 0x140 PF: > { %s13_s12 = sadd.s32 1, %s988_s12  }
 0x141   : > { %p10_p4 = scmp.ge.s32.totalorder %s13_s12, 4  }
 0x143   :  { %12 = sbr.rel (!%p10_p4) target bundleno = 1 (0x1), region = 62 }

// kernel: discriminator_forward.9
= control target key start
LH: loop header
LB: loop body
LE: loop exit
PB: predicated region body
PF: predicated region fallthrough
CT: control target
= control target key end

     0   :  { %v559_v43 = vmov 1983009808   ;;  %v109_v45 = vlaneseq  ;;  %vm561_vm0 = vmmov 0   ;;  %vm133_vm1 = vcmask 523264   ;;  %s827_s1 = inlined_call_operand.vmem [shape: f32[576,32], index: 1, kind: input, shape index: {}]   ;;  %s828_s0 = inlined_call_operand.vmem [shape: f32[2,576], index: 0, kind: input, shape index: {}]   ;;  %s829_s4 = inlined_call_operand.<no memory space> [shape: f32[1,1], index: 4, kind: input, shape index: {}]   ;;  %s830_s2 = inlined_call_operand.vmem [shape: f32[1,32], index: 2, kind: input, shape index: {}]   ;;  %s831_s3 = inlined_call_operand.vmem [shape: f32[1,32], index: 3, kind: input, shape index: {}]   ;;  %s832_s5 = inlined_call_operand.vmem [shape: f32[2,1], index: 5, kind: output, shape index: {}]  }
   0x1   :  { %v40_v0 = vld [vmem:[%s827_s1 + $0x80] sm:$0xff]  ;;  %v41_v1 = vld [vmem:[%s827_s1 + $0x88] sm:$0xff]  ;;  %v42_v11 = vld [vmem:[%s827_s1 + $0x90] sm:$0xff]  ;;  %v107_v44 = vunpack.c.l.s4 %v559_v43  ;;  %vm357_vm3 = vcmask 254976   ;;  %vm369_vm4 = vcmask 1024  }
   0x2   :  { %v24_v2 = vld [vmem:[%s827_s1] sm:$0xff]  ;;  %v478_v3 = vpack.c.bf16 %v41_v1, %v40_v0  ;;  %v25_v4 = vld [vmem:[%s827_s1 + $0x8] sm:$0xff]  ;;  %v43_v13 = vld [vmem:[%s827_s1 + $0x98] sm:$0xff]  ;;  %v110_v60 = vshrl.u32 %v109_v45, 7 }
   0x3   :  { %v72_v5 = vld [vmem:[%s827_s1 + $0x180] sm:$0xff]  ;;  %v73_v6 = vld [vmem:[%s827_s1 + $0x188] sm:$0xff]  ;;  %v480_v7 = vpack.c.bf16 %v25_v4, %v24_v2  ;;  %v26_v14 = vld [vmem:[%s827_s1 + $0x10] sm:$0xff]  ;;  %v482_v16 = vpack.c.bf16 %v43_v13, %v42_v11  ;;  %v108_v59 = vunpack.c.0.s8 %v107_v44 }
   0x4   :  { %v510_v8 = vpack.c.bf16 %v73_v6, %v72_v5  ;;  %v56_v9 = vld [vmem:[%s827_s1 + $0x100] sm:$0xff]  ;;  %v57_v10 = vld [vmem:[%s827_s1 + $0x108] sm:$0xff]  ;;  %479 = vmatprep.subr.bf16.mxu0 %v478_v3  ;;  %v27_v15 = vld [vmem:[%s827_s1 + $0x18] sm:$0xff] }
   0x5   :  { %v512_v12 = vpack.c.bf16 %v57_v10, %v56_v9  ;;  %481 = vmatpush3.bf16.msra.mxu0 %v480_v7  ;;  %v484_v17 = vpack.c.bf16 %v27_v15, %v26_v14  ;;  %v74_v18 = vld [vmem:[%s827_s1 + $0x190] sm:$0xff]  ;;  %v75_v19 = vld [vmem:[%s827_s1 + $0x198] sm:$0xff]  ;;  %v44_v23 = vld [vmem:[%s827_s1 + $0xa0] sm:$0xff]  ;;  %v111_v10 = vsub.s32 %v108_v59, %v110_v60  ;;  %v10_v59 = vstv %s829_s4 }
   0x6   :  { %511 = vmatprep.subr.bf16.mxu1 %v510_v8  ;;  %v58_v20 = vld [vmem:[%s827_s1 + $0x110] sm:$0xff]  ;;  %v514_v21 = vpack.c.bf16 %v75_v19, %v74_v18  ;;  %v59_v22 = vld [vmem:[%s827_s1 + $0x118] sm:$0xff]  ;;  %v45_v24 = vld [vmem:[%s827_s1 + $0xa8] sm:$0xff]  ;;  %483 = vmatprep.subr.bf16.mxu0 %v482_v16  ;;  %11 = vst [vmem:[#allocation2] sm:$0x1] %v10_v59 }
   0x7   :  { %513 = vmatpush3.bf16.msra.mxu1 %v512_v12  ;;  %v516_v25 = vpack.c.bf16 %v59_v22, %v58_v20  ;;  %v486_v26 = vpack.c.bf16 %v45_v24, %v44_v23  ;;  %v28_v27 = vld [vmem:[%s827_s1 + $0x20] sm:$0xff]  ;;  %v29_v28 = vld [vmem:[%s827_s1 + $0x28] sm:$0xff]  ;;  %v46_v35 = vld [vmem:[%s827_s1 + $0xb0] sm:$0xff] }
   0x8   :  { %v76_v29 = vld [vmem:[%s827_s1 + $0x1a0] sm:$0xff]  ;;  %515 = vmatprep.subr.bf16.mxu1 %v514_v21  ;;  %v77_v30 = vld [vmem:[%s827_s1 + $0x1a8] sm:$0xff]  ;;  %v488_v33 = vpack.c.bf16 %v29_v28, %v28_v27  ;;  %v47_v36 = vld [vmem:[%s827_s1 + $0xb8] sm:$0xff] }
   0x9   :  { %v60_v31 = vld [vmem:[%s827_s1 + $0x120] sm:$0xff]  ;;  %v61_v32 = vld [vmem:[%s827_s1 + $0x128] sm:$0xff]  ;;  %485 = vmatpush3.bf16.msra.mxu0 %v484_v17  ;;  %v518_v34 = vpack.c.bf16 %v77_v30, %v76_v29  ;;  %v30_v37 = vld [vmem:[%s827_s1 + $0x30] sm:$0xff]  ;;  %v490_v39 = vpack.c.bf16 %v47_v36, %v46_v35 }
   0xa   :  { %487 = vmatprep.subr.bf16.mxu0 %v486_v26  ;;  %v520_v38 = vpack.c.bf16 %v61_v32, %v60_v31  ;;  %v31_v40 = vld [vmem:[%s827_s1 + $0x38] sm:$0xff]  ;;  %v78_v41 = vld [vmem:[%s827_s1 + $0x1b0] sm:$0xff]  ;;  %v48_v49 = vld [vmem:[%s827_s1 + $0xc0] sm:$0xff] }
   0xb   :  { %517 = vmatpush3.bf16.msra.mxu1 %v516_v25  ;;  %v79_v42 = vld [vmem:[%s827_s1 + $0x1b8] sm:$0xff]  ;;  %v62_v47 = vld [vmem:[%s827_s1 + $0x130] sm:$0xff]  ;;  %v49_v50 = vld [vmem:[%s827_s1 + $0xc8] sm:$0xff]  ;;  %v492_v51 = vpack.c.bf16 %v31_v40, %v30_v37 }
   0xc   :  { %519 = vmatprep.subr.bf16.mxu1 %v518_v34  ;;  %v522_v46 = vpack.c.bf16 %v79_v42, %v78_v41  ;;  %v63_v48 = vld [vmem:[%s827_s1 + $0x138] sm:$0xff]  ;;  %v80_v52 = vld [vmem:[%s827_s1 + $0x1c0] sm:$0xff]  ;;  %v81_v53 = vld [vmem:[%s827_s1 + $0x1c8] sm:$0xff]  ;;  %v494_v55 = vpack.c.bf16 %v49_v50, %v48_v49 }
   0xd   :  { %489 = vmatpush3.bf16.msra.mxu0 %v488_v33  ;;  %v524_v54 = vpack.c.bf16 %v63_v48, %v62_v47  ;;  %v32_v56 = vld [vmem:[%s827_s1 + $0x40] sm:$0xff]  ;;  %v33_v57 = vld [vmem:[%s827_s1 + $0x48] sm:$0xff]  ;;  %v526_v61 = vpack.c.bf16 %v81_v53, %v80_v52  ;;  %v50_v63 = vld [vmem:[%s827_s1 + $0xd0] sm:$0xff]  ;;  %v560_v47 = vmov 0.0|0.0   ;;  %v562_v53 = vmov 0.0  }
   0xe   :  { %491 = vmatprep.subr.bf16.mxu0 %v490_v39  ;;  %v64_v58 = vld [vmem:[%s827_s1 + $0x140] sm:$0xff]  ;;  %v65_v62 = vld [vmem:[%s827_s1 + $0x148] sm:$0xff]  ;;  %v51_v0 = vld [vmem:[%s827_s1 + $0xd8] sm:$0xff]  ;;  %v496_v3 = vpack.c.bf16 %v33_v57, %v32_v56 }
   0xf   :  { %521 = vmatpush3.bf16.msra.mxu1 %v520_v38  ;;  %v82_v1 = vld [vmem:[%s827_s1 + $0x1d0] sm:$0xff]  ;;  %v83_v2 = vld [vmem:[%s827_s1 + $0x1d8] sm:$0xff]  ;;  %v528_v5 = vpack.c.bf16 %v65_v62, %v64_v58  ;;  %v498_v6 = vpack.c.bf16 %v51_v0, %v50_v63  ;;  %v52_v12 = vld [vmem:[%s827_s1 + $0xe0] sm:$0xff] }
  0x10   :  { %523 = vmatprep.subr.bf16.mxu1 %v522_v46  ;;  %v34_v4 = vld [vmem:[%s827_s1 + $0x50] sm:$0xff]  ;;  %v35_v7 = vld [vmem:[%s827_s1 + $0x58] sm:$0xff]  ;;  %v530_v11 = vpack.c.bf16 %v83_v2, %v82_v1  ;;  %v53_v13 = vld [vmem:[%s827_s1 + $0xe8] sm:$0xff] }
  0x11   :  { %493 = vmatpush3.bf16.msra.mxu0 %v492_v51  ;;  %v66_v8 = vld [vmem:[%s827_s1 + $0x150] sm:$0xff]  ;;  %v67_v9 = vld [vmem:[%s827_s1 + $0x158] sm:$0xff]  ;;  %v84_v14 = vld [vmem:[%s827_s1 + $0x1e0] sm:$0xff]  ;;  %v500_v16 = vpack.c.bf16 %v35_v7, %v34_v4  ;;  %v502_v19 = vpack.c.bf16 %v53_v13, %v52_v12 }
  0x12   :  { %495 = vmatprep.subr.bf16.mxu0 %v494_v55  ;;  %v85_v15 = vld [vmem:[%s827_s1 + $0x1e8] sm:$0xff]  ;;  %v532_v17 = vpack.c.bf16 %v67_v9, %v66_v8  ;;  %v22_v18 = vld [vmem:[%s828_s0] sm:$0xff]  ;;  %v54_v27 = vld [vmem:[%s827_s1 + $0xf0] sm:$0xff] }
  0x13   :  { %525 = vmatpush3.bf16.msra.mxu1 %v524_v54  ;;  %v36_v20 = vld [vmem:[%s827_s1 + $0x60] sm:$0xff]  ;;  %v37_v21 = vld [vmem:[%s827_s1 + $0x68] sm:$0xff]  ;;  %v112_v23 = vrot.slane %v22_v18, %v111_v10  ;;  %v105_v24 = vcombine.high %v22_v18, %v22_v18  ;;  %v534_v25 = vpack.c.bf16 %v85_v15, %v84_v14  ;;  %v55_v28 = vld [vmem:[%s827_s1 + $0xf8] sm:$0xff] }
  0x14   :  { %527 = vmatprep.subr.bf16.mxu1 %v526_v61  ;;  %v68_v22 = vld [vmem:[%s827_s1 + $0x160] sm:$0xff]  ;;  %v69_v26 = vld [vmem:[%s827_s1 + $0x168] sm:$0xff]  ;;  %v86_v29 = vld [vmem:[%s827_s1 + $0x1f0] sm:$0xff]  ;;  %v504_v33 = vpack.c.bf16 %v37_v21, %v36_v20  ;;  %v506_v35 = vpack.c.bf16 %v55_v28, %v54_v27 }
  0x15   :  { %497 = vmatpush3.bf16.msra.mxu0 %v496_v3  ;;  %v87_v30 = vld [vmem:[%s827_s1 + $0x1f8] sm:$0xff]  ;;  %v120_v31 = vcombine.high %v112_v23, %v112_v23  ;;  %v119_v32 = vrot.slane %v105_v24, %v111_v10  ;;  %v536_v34 = vpack.c.bf16 %v69_v26, %v68_v22  ;;  %v38_v36 = vld [vmem:[%s827_s1 + $0x70] sm:$0xff]  ;;  %v88_v44 = vld [vmem:[%s827_s1 + $0x200] sm:$0xff] }
  0x16   :  { %499 = vmatprep.subr.bf16.mxu0 %v498_v6  ;;  %v39_v37 = vld [vmem:[%s827_s1 + $0x78] sm:$0xff]  ;;  %v538_v39 = vpack.c.bf16 %v87_v30, %v86_v29  ;;  %v70_v40 = vld [vmem:[%s827_s1 + $0x170] sm:$0xff]  ;;  %v89_v45 = vld [vmem:[%s827_s1 + $0x208] sm:$0xff] }
  0x17   :  { %529 = vmatpush3.bf16.msra.mxu1 %v528_v5  ;;  %v121_v38 = vcombine.high %v119_v32, %v119_v32  ;;  %200 = vmatprep.mubr.f32.mxu0 %v120_v31  ;;  %v71_v41 = vld [vmem:[%s827_s1 + $0x178] sm:$0xff]  ;;  %v508_v42 = vpack.c.bf16 %v39_v37, %v38_v36  ;;  %v543_v46 = vpack.c.bf16 %v89_v45, %v88_v44  ;;  %v90_v48 = vld [vmem:[%s827_s1 + $0x210] sm:$0xff]  ;;  %v92_v51 = vld [vmem:[%s827_s1 + $0x220] sm:$0xff] }
  0x18   :  { %531 = vmatprep.subr.bf16.mxu1 %v530_v11  ;;  %v540_v43 = vpack.c.bf16 %v71_v41, %v70_v40  ;;  %v91_v49 = vld [vmem:[%s827_s1 + $0x218] sm:$0xff]  ;;  %v93_v52 = vld [vmem:[%s827_s1 + $0x228] sm:$0xff]  ;;  %v94_v55 = vld [vmem:[%s827_s1 + $0x230] sm:$0xff] }
  0x19   :  { %501 = vmatpush3.bf16.msra.mxu0 %v500_v16  ;;  %270 = vmatprep.mubr.f32.mxu1 %v121_v38  ;;  %v546_v50 = vpack.c.bf16 %v91_v49, %v90_v48  ;;  %v549_v54 = vpack.c.bf16 %v93_v52, %v92_v51  ;;  %v95_v56 = vld [vmem:[%s827_s1 + $0x238] sm:$0xff]  ;;  %v376_v58 = vld.sshfl [vmem:[%s828_s0 + $0x8] sm:$0x3 pattern:$0x76325410] }
  0x1a   :  { %503 = vmatprep.subr.bf16.mxu0 %v502_v19  ;;  %v552_v57 = vpack.c.bf16 %v95_v56, %v94_v55  ;;  %v375_v61 = vld [vmem:[%s830_s2] ss:$0 sm:$0xff] }
  0x1b   :  { %533 = vmatpush3.bf16.msra.mxu1 %v532_v17  ;;  %v378_v9 = vld [vmem:[%s831_s3] ss:$0 sm:$0xff] }
  0x1c   :  { %535 = vmatprep.subr.bf16.mxu1 %v534_v25  ;;  %v379_v13 = vld [vmem:[#allocation2] ss:$0 sm:$0xff] }
  0x1d   :  { %505 = vmatpush3.bf16.msra.mxu0 %v504_v33 }
  0x1e   :  { %507 = vmatprep.subr.bf16.mxu0 %v506_v35 }
  0x1f   :  { %537 = vmatpush3.bf16.msra.mxu1 %v536_v34 }
  0x20   :  { %539 = vmatprep.subr.bf16.mxu1 %v538_v39 }
  0x21   :  { %509 = vmatpush3.bf16.msra.mxu0 %v508_v42 }
  0x22   :  { %542 = vmatprep.subr.bf16.mxu0 %v560_v47 }
  0x23   :  { %541 = vmatpush3.bf16.msra.mxu1 %v540_v43 }
  0x24   :  { %201 = vmatmul.mubr.f32.vlgmr.msra.gmra.mrb[0].mxu0 %v112_v23 }
  0x25   :  { %544 = vmatpush3.bf16.msra.mxu0 %v543_v46  ;;  %475 = vmatprep.mubr.msk.f32.mxu0 %vm561_vm0, %v562_v53 }
  0x26   :  { %271 = vmatmul.mubr.f32.vlgmr.msra.gmra.mrb[0].mxu1 %v119_v32  ;;  %545 = vmatprep.subr.bf16.mxu0 %v560_v47 }
  0x29   :  { %547 = vmatpush3.bf16.msra.mxu0 %v546_v50 }
  0x2a   :  { %548 = vmatprep.subr.bf16.mxu0 %v560_v47 }
  0x2d   :  { %550 = vmatpush3.bf16.msra.mxu0 %v549_v54 }
  0x2e   :  { %551 = vmatprep.subr.bf16.mxu0 %v560_v47 }
  0x31   :  { %553 = vmatpush3.bf16.msra.mxu0 %v552_v57 }
  0x34   :  { %476 = vmatmul.mubr.msk.f32.vlgmr.msra.gmra.mrb[2].mxu0 %vm133_vm1, %v376_v58 }
  0xf7   :  { %v412_v60 = vpop.f32.mrb[0].mxu0 }
  0xf8   :  { %v413_v62 = vpop.f32.mrb[1].mxu0 }
  0xf9   :  { %v447_v63 = vpop.f32.mrb[0].mxu1  ;;  %v414_v0 = vadd.f32 %v413_v62, %v412_v60 }
  0xfa   :  { %v448_v1 = vpop.f32.mrb[1].mxu1 }
  0xfb   :  { %v449_v2 = vadd.f32 %v448_v1, %v447_v63  ;;  %v203_v3 = vadd.f32 %v414_v0, %v375_v61 }
  0xfd   :  { %v273_v4 = vadd.f32 %v449_v2, %v203_v3 }
 0x107   :  { %v342_v5 = vpop.f32.mrb[2].mxu0 }
 0x108   :  { %v343_v6 = vadd.f32 %v342_v5, %v273_v4  ;;  %v477_v7 = vpop.f32.mrb[3].mxu0 }
 0x10a   :  { %v347_v8 = vmul.f32 0.2, %v343_v6  ;;  %vm346_vm2 = vcmp.ge.f32.partialorder %v343_v6, 0.0 }
 0x10c   :  { %v348_v10 = vsel %vm346_vm2, %v343_v6, %v347_v8 }
 0x10d   :  { %v356_v11 = vmul.f32 %v378_v9, %v348_v10 }
 0x10f   :  { %v358_v12 = vsel %vm357_vm3, %v356_v11, 0.0 }
 0x110   :  { %359 = vadd.xlane.f32.xlu0 %v358_v12 }
 0x19d   :  { %v360_v14 = vpop.xlane.xlu0 %359 }
 0x19e   :  { %v368_v15 = vadd.f32 %v379_v13, %v360_v14 }
 0x1a0   :  { %370 = vst.msk [vmem:[%s832_s5] sm:$0x3] %vm369_vm4, %v368_v15 }

</bundles_post_ra>
